<compile_context>
chip_gen: v5e
topology: v5e:2x2
jax: 0.10.0
libtpu: 0.0.40
codegen_flags: <defaults>
</compile_context>

<pallas_src>
import functools

import jax
import jax.numpy as jnp
from jax.experimental import pallas as pl
from jax.experimental.pallas import tpu as pltpu


# ----------------------------------------------------------------------------
# Fused StackedPairStack head kernel
#   one grid step = Gb batch elements x {WT, MUT}
# ----------------------------------------------------------------------------
def fused_pairstack_kernel(xw_ref, xm_ref, covw_ref, covm_ref,
                           w1_ref, b1_ref, w2aug_ref, b2aug_ref,
                           wac_ref, wvc_ref, bval_ref, o_ref):
    """Refs per grid step:

    xw/xm   : (Gb, R, 512) bf16   ROI-selected node features (pad rows = -1)
    covw/m  : (Gb, R, R, 26) bf16 ROI pair features (padded entries = -1)
    w1/b1   : (512, 128) bf16 / (1, 128) f32     repr_linear layer 1
    w2aug   : (128, 129) bf16   [w2@wvi | w2@wvj | w2@w_att_j]
    b2aug   : (1, 129) f32      [b2@wvi | b2@wvj | b2@w_att_j]
    wac     : (1, 26) f32       att_linear weights on the cov channels
    wvc     : (26, 64) f32      val_linear weights on the cov channels
    bval    : (1, 64) f32       val_linear bias
    o_ref   : (Gb, 128) f32     [wt_pooled(64) | mt_pooled(64)] per batch row
    """
    Gb, R, D = xw_ref.shape
    C = covw_ref.shape[-1]
    V = bval_ref.shape[1]
    G2 = 2 * Gb
    NEG = jnp.float32(-1e30)

    # ---- repr MLP on all 2*Gb*R ROI rows in two lane-dense MXU matmuls -----
    x = jnp.concatenate([xw_ref[...].reshape(Gb * R, D),
                         xm_ref[...].reshape(Gb * R, D)], axis=0)      # (2GbR, 512)
    h = jnp.dot(x, w1_ref[...], preferred_element_type=jnp.float32) + b1_ref[...]
    h = jnp.maximum(h, 0.0).astype(jnp.bfloat16)                       # (2GbR, 128)
    # aug columns = [selb@wvi (64) | selb@wvj (64) | selb@w_att_j (1)]
    aug = jnp.dot(h, w2aug_ref[...],
                  preferred_element_type=jnp.float32) + b2aug_ref[...]
    aug = aug.reshape(G2, R, aug.shape[-1])                            # (G2, R, 129)

    # ---- cov half of the (never materialized) pair tensor ------------------
    cov = jnp.concatenate([covw_ref[...], covm_ref[...]], axis=0)      # (G2,R,R,C)
    cov32 = cov.astype(jnp.float32)

    # Validity mask straight from the cov block (saves a full XLA/HBM pass).
    pad = jnp.all(cov32 == -1.0, axis=-1)                              # (G2,R,R)
    valid_j = jnp.logical_not(pad[:, 0:1, :])                          # (G2,1,R)
    # TODO(synk): row mask taken from column 0 of cov; identical to the
    # reference's row-0 mask because cov padding is symmetric (valid_i & valid_j).
    valid_i = jnp.logical_not(pad[:, :, 0:1]).astype(jnp.float32)      # (G2,R,1)

    # ---- attention logits.  Per-row constants (selb_i term, att bias) cancel
    # in the row softmax, so only the cov term and the selb_j term survive. ---
    att = jnp.sum(cov32 * wac_ref[...], axis=-1)                       # (G2,R,R)
    att = jnp.where(valid_j, att, NEG)
    e = jnp.exp(att - jnp.max(att, axis=-1, keepdims=True))            # (G2,R,R)

    a_j = aug[..., 2 * V:2 * V + 1]                                    # (G2,R,1)
    w_j = jnp.exp(a_j - jnp.max(a_j, axis=1, keepdims=True))           # (G2,R,1)

    # ---- val = val_linear(pair.sum(dim=-2)), decomposed over the concat ----
    cov_sum = jnp.sum(cov32, axis=2)                                   # (G2,R,C)
    cov_val = jnp.dot(cov_sum.reshape(G2 * R, C), wvc_ref[...],
                      preferred_element_type=jnp.float32).reshape(G2, R, V)
    val = (cov_val
           + jnp.float32(R) * aug[..., 0:V]                            # R * selb_i @ wvi
           + jnp.sum(aug[..., V:2 * V], axis=1, keepdims=True)         # (sum_j selb_j)@wvj
           + bval_ref[...])                                            # (G2,R,V)

    # ---- softmax-weighted pooling.  The selb_j exp factor scales val rows and
    # the softmax denominator rides along as column V -> one batched matmul,
    # no transposes. -----------------------------------------------------------
    val_ext = jnp.concatenate([val * w_j, w_j], axis=-1)               # (G2,R,V+1)
    pooled_ext = jnp.einsum('gij,gjv->giv', e, val_ext,
                            preferred_element_type=jnp.float32)        # (G2,R,V+1)
    numer = pooled_ext[..., 0:V]
    denom = jnp.maximum(pooled_ext[..., V:V + 1], jnp.float32(1e-30))
    rows = numer * pl.reciprocal(denom, approx=True) * valid_i         # (G2,R,V)
    pooled = jnp.sum(rows, axis=1) * jnp.float32(1.0 / R)              # (G2,V)

    # ---- lane-dense output row: [wt_pool | mt_pool] (128 lanes, unmasked vst)
    p2 = pooled.reshape(2, Gb, V)
    o_ref[...] = jnp.concatenate([p2[0], p2[1]], axis=-1)              # (Gb,2V)


def _choose_block_b(B, R, C):
    """Batch elements per grid step (each step also covers both WT and MUT)."""
    rows_target = 256                          # MXU M target (v6e/v7x); v5e saturates at 128
    gb = max(1, rows_target // max(1, 2 * R))
    # VMEM guard: keep per-step (double-buffered) input blocks under ~8 MiB
    # so the kernel stays comfortably inside v7x's 64 MiB VMEM.
    per_elem = 2 * (R * 512 * 2 + R * R * C * 2)          # bytes, bf16, wt+mt
    gb = max(1, min(gb, (8 << 20) // max(1, 2 * per_elem)))
    gb = min(gb, B)
    # Prefer >= 2 parallel grid steps (keeps both v7x TensorCores busy) as long
    # as each step still feeds the MXU with >= 128 rows.
    if gb == B and B % 2 == 0 and (B // 2) * 2 * R >= 128:
        gb = B // 2
    if gb < B and gb % 8:
        gb = max(8, (gb // 8) * 8)             # keep the output block 8-row aligned
    return gb


def fused_pairstack_pair(sel_wt, sel_mt, cov_wt, cov_mt, params):
    """sel_*: (B, R, 512) bf16, cov_*: (B, R, R, 26) bf16.
    Returns (B, 128) rows [wt_pooled(64) | mt_pooled(64)]."""
    B, R, D = sel_wt.shape
    C = cov_wt.shape[-1]                    # 26
    H = params["repr_w1"].shape[1]          # 128
    S = params["repr_w2"].shape[1]          # 32
    V = params["val_w"].shape[1]            # 64

    # ---- fold repr_linear's 2nd layer into the downstream projections ------
    w2 = params["repr_w2"]
    b2 = params["repr_b2"].reshape(1, S)
    w_att = params["att_w"]                 # (90, 1)
    w_val = params["val_w"]                 # (90, 64)
    waj = w_att[C + S:, :]                  # selb_j -> att   (32, 1)
    wvi = w_val[C:C + S]                    # selb_i -> val   (32, 64)
    wvj = w_val[C + S:]                     # selb_j -> val   (32, 64)
    # att_w[C:C+S] (selb_i term) and att_b are per-row softmax constants and
    # cancel exactly, so they are not shipped to the kernel.
    w2aug = jnp.concatenate([w2 @ wvi, w2 @ wvj, w2 @ waj], axis=1)    # (128, 129)
    b2aug = jnp.concatenate([b2 @ wvi, b2 @ wvj, b2 @ waj], axis=1)    # (1, 129)
    NA = w2aug.shape[1]

    w1 = params["repr_w1"].astype(jnp.bfloat16)
    b1 = params["repr_b1"].reshape(1, H)
    wac = w_att[:C, 0].reshape(1, C)
    wvc = w_val[:C]
    bval = params["val_b"].reshape(1, V)

    Gb = _choose_block_b(B, R, C)
    num_blocks = pl.cdiv(B, Gb)
    B_pad = num_blocks * Gb
    if B_pad != B:
        padn = B_pad - B
        pad3 = ((0, padn), (0, 0), (0, 0))
        pad4 = ((0, padn), (0, 0), (0, 0), (0, 0))
        sel_wt = jnp.pad(sel_wt, pad3, constant_values=-1.0)
        sel_mt = jnp.pad(sel_mt, pad3, constant_values=-1.0)
        cov_wt = jnp.pad(cov_wt, pad4, constant_values=-1.0)
        cov_mt = jnp.pad(cov_mt, pad4, constant_values=-1.0)

    out = pl.pallas_call(
        fused_pairstack_kernel,
        out_shape=jax.ShapeDtypeStruct((B_pad, 2 * V), jnp.float32),
        grid=(num_blocks,),
        in_specs=[
            pl.BlockSpec((Gb, R, D), lambda n: (n, 0, 0)),
            pl.BlockSpec((Gb, R, D), lambda n: (n, 0, 0)),
            pl.BlockSpec((Gb, R, R, C), lambda n: (n, 0, 0, 0)),
            pl.BlockSpec((Gb, R, R, C), lambda n: (n, 0, 0, 0)),
            pl.BlockSpec((D, H), lambda n: (0, 0)),
            pl.BlockSpec((1, H), lambda n: (0, 0)),
            pl.BlockSpec((H, NA), lambda n: (0, 0)),
            pl.BlockSpec((1, NA), lambda n: (0, 0)),
            pl.BlockSpec((1, C), lambda n: (0, 0)),
            pl.BlockSpec((C, V), lambda n: (0, 0)),
            pl.BlockSpec((1, V), lambda n: (0, 0)),
        ],
        out_specs=pl.BlockSpec((Gb, 2 * V), lambda n: (n, 0)),
        compiler_params=pltpu.CompilerParams(
            dimension_semantics=("parallel",),
            vmem_limit_bytes=32 * 1024 * 1024),
    )(sel_wt, sel_mt, cov_wt, cov_mt,
      w1, b1, w2aug.astype(jnp.bfloat16), b2aug, wac, wvc, bval)
    return out[:B]                                                     # (B, 128)


# ----------------------------------------------------------------------------
# Predicter: tiny 2-layer MLP, plain jnp (XLA fuses it; a pallas_call here
# would be pure launch overhead).
# ----------------------------------------------------------------------------
def predicter_mlp(z, params):
    h = jnp.maximum(z @ params["pred_w1"] + params["pred_b1"], 0.0)
    return h @ params["pred_w2"] + params["pred_b2"]


# ----------------------------------------------------------------------------
# Plain-JAX glue (data-dependent gathers / reshapes)
# ----------------------------------------------------------------------------
def process_node_feature(ts, msk):
    """Scatter flat per-graph node features (N, h) into (B, L, h) padded with 0."""
    B, L = msk.shape
    lens = msk.sum(axis=1)
    starts = jnp.cumsum(lens) - lens
    pos = jnp.arange(L)
    idx = starts[:, None] + pos[None, :]
    valid = pos[None, :] < lens[:, None]
    idx = jnp.clip(idx, 0, ts.shape[0] - 1)
    gathered = ts[idx]                                   # (B, L, h)
    return jnp.where(valid[..., None], gathered, 0.0)


def select_roi(inp, mask_roi, roi_max_len):
    """inp[b, mask_roi[b]==1] padded with -1 to roi_max_len, per batch."""
    roi = (mask_roi == 1)
    order = jnp.argsort(jnp.logical_not(roi).astype(jnp.int32), axis=1, stable=True)
    k = roi.sum(axis=1)
    gathered = jnp.take_along_axis(inp, order[:, :, None], axis=1)[:, :roi_max_len]
    valid = jnp.arange(roi_max_len)[None, :] < k[:, None]
    return jnp.where(valid[..., None], gathered, -1.0)


def model_v7_forward(params, node_wt, node_mut, mask, cov_wt, cov_mut,
                     wt_mask_roi, mut_mask_roi, dual=True):
    R = cov_wt.shape[1]

    inp_wt = process_node_feature(node_wt, mask)         # (B, L, 512)
    inp_mt = process_node_feature(node_mut, mask)
    sel_wt = select_roi(inp_wt, wt_mask_roi, R).astype(jnp.bfloat16)   # (B, R, 512)
    sel_mt = select_roi(inp_mt, mut_mask_roi, R).astype(jnp.bfloat16)

    rows = fused_pairstack_pair(sel_wt, sel_mt,
                                cov_wt.astype(jnp.bfloat16),
                                cov_mut.astype(jnp.bfloat16),
                                params)                   # (B, 128) = [wt || mt]

    res1 = predicter_mlp(rows, params)                    # (B, 1)
    if not dual:
        return res1
    V = rows.shape[1] // 2
    rows_swapped = jnp.concatenate([rows[:, V:], rows[:, :V]], axis=1)
    res2 = predicter_mlp(rows_swapped, params)            # (B, 1)
    return res1, res2


# ----------------------------------------------------------------------------
# Deterministic parameter init
# ----------------------------------------------------------------------------
def init_params(key):
    ks = jax.random.split(key, 6)

    def w(k, shape, scale=0.05):
        return (scale * jax.random.normal(k, shape)).astype(jnp.float32)

    C = 26 + 32 * 2  # c_z = 90
    return dict(
        repr_w1=w(ks[0], (512, 128)), repr_b1=jnp.zeros((128,), jnp.float32),
        repr_w2=w(ks[1], (128, 32)),  repr_b2=jnp.zeros((32,), jnp.float32),
        att_w=w(ks[2], (C, 1)),       att_b=jnp.full((1,), 0.01, jnp.float32),
        val_w=w(ks[3], (C, 64)),      val_b=jnp.zeros((64,), jnp.float32),
        pred_w1=w(ks[4], (128, 32)),  pred_b1=jnp.zeros((32,), jnp.float32),
        pred_w2=w(ks[5], (32, 1)),    pred_b2=jnp.zeros((1,), jnp.float32),
    )


# ----------------------------------------------------------------------------
# Example run
# ----------------------------------------------------------------------------
if __name__ == "__main__":
    key = jax.random.PRNGKey(0)
    kp, kw, km, kc1, kc2 = jax.random.split(key, 5)

    B, L, R = 2, 16, 8          # batch, max seq len, roi_max_len
    lens = [12, 10]             # valid node counts per graph
    N = sum(lens)               # 22 flat nodes
    kroi = [6, 5]               # ROI counts per batch (<= R)

    params = init_params(kp)

    node_wt = jax.random.normal(kw, (N, 512), dtype=jnp.float32)
    node_mut = jax.random.normal(km, (N, 512), dtype=jnp.float32)

    mask = jnp.zeros((B, L), jnp.int32).at[0, :lens[0]].set(1).at[1, :lens[1]].set(1)
    wt_mask_roi = jnp.zeros((B, L), jnp.int32).at[0, 0:6].set(1).at[1, 2:7].set(1)
    mut_mask_roi = jnp.zeros((B, L), jnp.int32).at[0, 1:7].set(1).at[1, 0:5].set(1)

    # covariance-style ROI pair features; padded rows/cols are all -1.
    # Upstream producer emits bf16 (halves the dominant HBM stream).
    ii = jnp.arange(R)
    kvec = jnp.array(kroi)
    valid2d = (ii[None, :, None] < kvec[:, None, None]) & (ii[None, None, :] < kvec[:, None, None])
    cov_wt = jnp.where(valid2d[..., None],
                       jax.random.normal(kc1, (B, R, R, 26), dtype=jnp.float32),
                       -1.0).astype(jnp.bfloat16)
    cov_mut = jnp.where(valid2d[..., None],
                        jax.random.normal(kc2, (B, R, R, 26), dtype=jnp.float32),
                        -1.0).astype(jnp.bfloat16)

    fwd = jax.jit(functools.partial(model_v7_forward, dual=True))
    res1, res2 = fwd(params, node_wt, node_mut, mask, cov_wt, cov_mut,
                     wt_mask_roi, mut_mask_roi)
    jax.block_until_ready((res1, res2))

    assert res1.shape == (B, 1) and res2.shape == (B, 1)
    assert bool(jnp.all(jnp.isfinite(res1))) and bool(jnp.all(jnp.isfinite(res2)))
    print("KERNEL_OK")
</pallas_src>

<mosaic_0001>
module attributes {stable_mosaic.version = 11 : i64} {
  func.func @fused_pairstack_kernel(%arg0: i32, %arg1: memref<2x8x512xbf16, #tpu.memory_space<vmem>>, %arg2: memref<2x8x512xbf16, #tpu.memory_space<vmem>>, %arg3: memref<2x8x8x26xbf16, #tpu.memory_space<vmem>>, %arg4: memref<2x8x8x26xbf16, #tpu.memory_space<vmem>>, %arg5: memref<512x128xbf16, #tpu.memory_space<vmem>>, %arg6: memref<1x128xf32, #tpu.memory_space<vmem>>, %arg7: memref<128x129xbf16, #tpu.memory_space<vmem>>, %arg8: memref<1x129xf32, #tpu.memory_space<vmem>>, %arg9: memref<1x26xf32, #tpu.memory_space<vmem>>, %arg10: memref<26x64xf32, #tpu.memory_space<vmem>>, %arg11: memref<1x64xf32, #tpu.memory_space<vmem>>, %arg12: memref<2x128xf32, #tpu.memory_space<vmem>>) attributes {dimension_semantics = [#tpu.dimension_semantics<parallel>], iteration_bounds = array<i64: 1>, scalar_prefetch = 0 : i64, scratch_operands = 0 : i64, tpu.core_type = #tpu.core_type<tc>, window_params = [{transform_indices = @transform_0, window_bounds = array<i64: 2, 8, 512>}, {transform_indices = @transform_1, window_bounds = array<i64: 2, 8, 512>}, {transform_indices = @transform_2, window_bounds = array<i64: 2, 8, 8, 26>}, {transform_indices = @transform_3, window_bounds = array<i64: 2, 8, 8, 26>}, {pipeline_mode = #tpu.pipeline_mode<synchronous>, transform_indices = @transform_4, window_bounds = array<i64: 512, 128>}, {pipeline_mode = #tpu.pipeline_mode<synchronous>, transform_indices = @transform_5, window_bounds = array<i64: 1, 128>}, {pipeline_mode = #tpu.pipeline_mode<synchronous>, transform_indices = @transform_6, window_bounds = array<i64: 128, 129>}, {pipeline_mode = #tpu.pipeline_mode<synchronous>, transform_indices = @transform_7, window_bounds = array<i64: 1, 129>}, {pipeline_mode = #tpu.pipeline_mode<synchronous>, transform_indices = @transform_8, window_bounds = array<i64: 1, 26>}, {pipeline_mode = #tpu.pipeline_mode<synchronous>, transform_indices = @transform_9, window_bounds = array<i64: 26, 64>}, {pipeline_mode = #tpu.pipeline_mode<synchronous>, transform_indices = @transform_10, window_bounds = array<i64: 1, 64>}, {transform_indices = @transform_11, window_bounds = array<i64: 2, 128>}]} {
    %c0 = arith.constant 0 : index
    %c0_0 = arith.constant 0 : index
    %c0_1 = arith.constant 0 : index
    %0 = vector.load %arg1[%c0, %c0_0, %c0_1] : memref<2x8x512xbf16, #tpu.memory_space<vmem>>, vector<2x8x512xbf16>
    %1 = vector.shape_cast %0 : vector<2x8x512xbf16> to vector<16x512xbf16>
    %c0_2 = arith.constant 0 : index
    %c0_3 = arith.constant 0 : index
    %c0_4 = arith.constant 0 : index
    %2 = vector.load %arg2[%c0_2, %c0_3, %c0_4] : memref<2x8x512xbf16, #tpu.memory_space<vmem>>, vector<2x8x512xbf16>
    %3 = vector.shape_cast %2 : vector<2x8x512xbf16> to vector<16x512xbf16>
    %4 = tpu.concatenate %1, %3 in 0 : vector<16x512xbf16>, vector<16x512xbf16> -> vector<32x512xbf16>
    %c0_5 = arith.constant 0 : index
    %c0_6 = arith.constant 0 : index
    %5 = vector.load %arg5[%c0_5, %c0_6] : memref<512x128xbf16, #tpu.memory_space<vmem>>, vector<512x128xbf16>
    %cst = arith.constant dense<0.000000e+00> : vector<32x128xf32>
    %6 = tpu.matmul %4, %5, %cst {dimension_numbers = #tpu.dot_dimension_numbers<[1], [0], [0], [1], [0, 0, 1, 1], [], []>} : vector<32x512xbf16>, vector<512x128xbf16>, vector<32x128xf32> -> vector<32x128xf32>
    %c0_7 = arith.constant 0 : index
    %c0_8 = arith.constant 0 : index
    %7 = vector.load %arg6[%c0_7, %c0_8] : memref<1x128xf32, #tpu.memory_space<vmem>>, vector<1x128xf32>
    %8 = vector.broadcast %7 : vector<1x128xf32> to vector<32x128xf32>
    %9 = arith.addf %6, %8 : vector<32x128xf32>
    %cst_9 = arith.constant 0.000000e+00 : f32
    %10 = vector.broadcast %cst_9 : f32 to vector<32x128xf32>
    %11 = arith.maximumf %9, %10 : vector<32x128xf32>
    %12 = arith.truncf %11 : vector<32x128xf32> to vector<32x128xbf16>
    %c0_10 = arith.constant 0 : index
    %c0_11 = arith.constant 0 : index
    %13 = vector.load %arg7[%c0_10, %c0_11] : memref<128x129xbf16, #tpu.memory_space<vmem>>, vector<128x129xbf16>
    %cst_12 = arith.constant dense<0.000000e+00> : vector<32x129xf32>
    %14 = tpu.matmul %12, %13, %cst_12 {dimension_numbers = #tpu.dot_dimension_numbers<[1], [0], [0], [1], [0, 0, 1, 1], [], []>} : vector<32x128xbf16>, vector<128x129xbf16>, vector<32x129xf32> -> vector<32x129xf32>
    %c0_13 = arith.constant 0 : index
    %c0_14 = arith.constant 0 : index
    %15 = vector.load %arg8[%c0_13, %c0_14] : memref<1x129xf32, #tpu.memory_space<vmem>>, vector<1x129xf32>
    %16 = vector.broadcast %15 : vector<1x129xf32> to vector<32x129xf32>
    %17 = arith.addf %14, %16 : vector<32x129xf32>
    %18 = vector.shape_cast %17 : vector<32x129xf32> to vector<4x8x129xf32>
    %c0_15 = arith.constant 0 : index
    %c0_16 = arith.constant 0 : index
    %c0_17 = arith.constant 0 : index
    %c0_18 = arith.constant 0 : index
    %19 = vector.load %arg3[%c0_15, %c0_16, %c0_17, %c0_18] : memref<2x8x8x26xbf16, #tpu.memory_space<vmem>>, vector<2x8x8x26xbf16>
    %c0_19 = arith.constant 0 : index
    %c0_20 = arith.constant 0 : index
    %c0_21 = arith.constant 0 : index
    %c0_22 = arith.constant 0 : index
    %20 = vector.load %arg4[%c0_19, %c0_20, %c0_21, %c0_22] : memref<2x8x8x26xbf16, #tpu.memory_space<vmem>>, vector<2x8x8x26xbf16>
    %21 = tpu.concatenate %19, %20 in 0 : vector<2x8x8x26xbf16>, vector<2x8x8x26xbf16> -> vector<4x8x8x26xbf16>
    %22 = arith.extf %21 : vector<4x8x8x26xbf16> to vector<4x8x8x26xf32>
    %cst_23 = arith.constant -1.000000e+00 : f32
    %23 = vector.broadcast %cst_23 : f32 to vector<4x8x8x26xf32>
    %24 = arith.cmpf oeq, %22, %23 : vector<4x8x8x26xf32>
    %cst_24 = arith.constant 1.000000e+00 : f32
    %cst_25 = arith.constant 0.000000e+00 : f32
    %25 = vector.broadcast %cst_24 : f32 to vector<4x8x8x26xf32>
    %26 = vector.broadcast %cst_25 : f32 to vector<4x8x8x26xf32>
    %27 = arith.select %24, %25, %26 : vector<4x8x8x26xi1>, vector<4x8x8x26xf32>
    %cst_26 = arith.constant dense<0x7F800000> : vector<4x8x8xf32>
    %28 = vector.multi_reduction <minimumf>, %27, %cst_26 [3] : vector<4x8x8x26xf32> to vector<4x8x8xf32>
    %cst_27 = arith.constant 0.000000e+00 : f32
    %29 = vector.broadcast %cst_27 : f32 to vector<4x8x8xf32>
    %30 = arith.cmpf ogt, %28, %29 : vector<4x8x8xf32>
    %31 = vector.extract_strided_slice %30 {offsets = [0, 0, 0], sizes = [4, 1, 8], strides = [1, 1, 1]} : vector<4x8x8xi1> to vector<4x1x8xi1>
    %cst_28 = arith.constant dense<true> : vector<4x1x8xi1>
    %32 = arith.xori %31, %cst_28 : vector<4x1x8xi1>
    %33 = vector.extract_strided_slice %30 {offsets = [0, 0, 0], sizes = [4, 8, 1], strides = [1, 1, 1]} : vector<4x8x8xi1> to vector<4x8x1xi1>
    %cst_29 = arith.constant dense<true> : vector<4x8x1xi1>
    %34 = arith.xori %33, %cst_29 : vector<4x8x1xi1>
    %35 = arith.extui %34 : vector<4x8x1xi1> to vector<4x8x1xi32>
    %36 = arith.sitofp %35 : vector<4x8x1xi32> to vector<4x8x1xf32>
    %c0_30 = arith.constant 0 : index
    %c0_31 = arith.constant 0 : index
    %37 = vector.load %arg9[%c0_30, %c0_31] : memref<1x26xf32, #tpu.memory_space<vmem>>, vector<1x26xf32>
    %38 = vector.shape_cast %37 : vector<1x26xf32> to vector<1x1x1x26xf32>
    %39 = vector.broadcast %38 : vector<1x1x1x26xf32> to vector<4x8x8x26xf32>
    %40 = arith.mulf %22, %39 : vector<4x8x8x26xf32>
    %cst_32 = arith.constant dense<0.000000e+00> : vector<4x8x8xf32>
    %41 = vector.multi_reduction <add>, %40, %cst_32 [3] : vector<4x8x8x26xf32> to vector<4x8x8xf32>
    %cst_33 = arith.constant -1.000000e+30 : f32
    %42 = vector.shape_cast %32 : vector<4x1x8xi1> to vector<4x1x8xi1>
    %43 = vector.broadcast %42 : vector<4x1x8xi1> to vector<4x8x8xi1>
    %44 = vector.broadcast %cst_33 : f32 to vector<4x8x8xf32>
    %45 = arith.select %43, %41, %44 : vector<4x8x8xi1>, vector<4x8x8xf32>
    %cst_34 = arith.constant dense<0xFF800000> : vector<4x8xf32>
    %46 = vector.multi_reduction <maximumf>, %45, %cst_34 [2] : vector<4x8x8xf32> to vector<4x8xf32>
    %47 = vector.shape_cast %46 : vector<4x8xf32> to vector<4x8x1xf32>
    %48 = vector.broadcast %47 : vector<4x8x1xf32> to vector<4x8x8xf32>
    %49 = arith.subf %45, %48 : vector<4x8x8xf32>
    %50 = math.exp %49 : vector<4x8x8xf32>
    %51 = vector.extract_strided_slice %18 {offsets = [0, 0, 128], sizes = [4, 8, 1], strides = [1, 1, 1]} : vector<4x8x129xf32> to vector<4x8x1xf32>
    %cst_35 = arith.constant dense<0xFF800000> : vector<4x1xf32>
    %52 = vector.multi_reduction <maximumf>, %51, %cst_35 [1] : vector<4x8x1xf32> to vector<4x1xf32>
    %53 = vector.shape_cast %52 : vector<4x1xf32> to vector<4x1x1xf32>
    %54 = vector.broadcast %53 : vector<4x1x1xf32> to vector<4x8x1xf32>
    %55 = arith.subf %51, %54 : vector<4x8x1xf32>
    %56 = math.exp %55 : vector<4x8x1xf32>
    %cst_36 = arith.constant dense<0.000000e+00> : vector<4x8x26xf32>
    %57 = vector.multi_reduction <add>, %22, %cst_36 [2] : vector<4x8x8x26xf32> to vector<4x8x26xf32>
    %58 = vector.shape_cast %57 : vector<4x8x26xf32> to vector<32x26xf32>
    %c0_37 = arith.constant 0 : index
    %c0_38 = arith.constant 0 : index
    %59 = vector.load %arg10[%c0_37, %c0_38] : memref<26x64xf32, #tpu.memory_space<vmem>>, vector<26x64xf32>
    %cst_39 = arith.constant dense<0.000000e+00> : vector<32x64xf32>
    %60 = tpu.matmul %58, %59, %cst_39 {dimension_numbers = #tpu.dot_dimension_numbers<[1], [0], [0], [1], [0, 0, 1, 1], [], []>} : vector<32x26xf32>, vector<26x64xf32>, vector<32x64xf32> -> vector<32x64xf32>
    %61 = vector.shape_cast %60 : vector<32x64xf32> to vector<4x8x64xf32>
    %62 = vector.extract_strided_slice %18 {offsets = [0, 0, 0], sizes = [4, 8, 64], strides = [1, 1, 1]} : vector<4x8x129xf32> to vector<4x8x64xf32>
    %cst_40 = arith.constant 8.000000e+00 : f32
    %63 = vector.broadcast %cst_40 : f32 to vector<4x8x64xf32>
    %64 = arith.mulf %63, %62 : vector<4x8x64xf32>
    %65 = arith.addf %61, %64 : vector<4x8x64xf32>
    %66 = vector.extract_strided_slice %18 {offsets = [0, 0, 64], sizes = [4, 8, 64], strides = [1, 1, 1]} : vector<4x8x129xf32> to vector<4x8x64xf32>
    %cst_41 = arith.constant dense<0.000000e+00> : vector<4x64xf32>
    %67 = vector.multi_reduction <add>, %66, %cst_41 [1] : vector<4x8x64xf32> to vector<4x64xf32>
    %68 = vector.shape_cast %67 : vector<4x64xf32> to vector<4x1x64xf32>
    %69 = vector.broadcast %68 : vector<4x1x64xf32> to vector<4x8x64xf32>
    %70 = arith.addf %65, %69 : vector<4x8x64xf32>
    %c0_42 = arith.constant 0 : index
    %c0_43 = arith.constant 0 : index
    %71 = vector.load %arg11[%c0_42, %c0_43] : memref<1x64xf32, #tpu.memory_space<vmem>>, vector<1x64xf32>
    %72 = vector.shape_cast %71 : vector<1x64xf32> to vector<1x1x64xf32>
    %73 = vector.broadcast %72 : vector<1x1x64xf32> to vector<4x8x64xf32>
    %74 = arith.addf %70, %73 : vector<4x8x64xf32>
    %75 = vector.broadcast %56 : vector<4x8x1xf32> to vector<4x8x64xf32>
    %76 = arith.mulf %74, %75 : vector<4x8x64xf32>
    %77 = tpu.concatenate %76, %56 in 2 : vector<4x8x64xf32>, vector<4x8x1xf32> -> vector<4x8x65xf32>
    "tpu.trace_start"() <{level = 10 : i32, message = "gij,gjv->giv"}> : () -> ()
    %cst_44 = arith.constant dense<0.000000e+00> : vector<4x8x65xf32>
    %78 = tpu.matmul %50, %77, %cst_44 {dimension_numbers = #tpu.dot_dimension_numbers<[2], [1], [1], [2], [0, 0, 0, 1, 1, 2], [0], [0]>} : vector<4x8x8xf32>, vector<4x8x65xf32>, vector<4x8x65xf32> -> vector<4x8x65xf32>
    "tpu.trace_stop"() : () -> ()
    %79 = vector.extract_strided_slice %78 {offsets = [0, 0, 0], sizes = [4, 8, 64], strides = [1, 1, 1]} : vector<4x8x65xf32> to vector<4x8x64xf32>
    %80 = vector.extract_strided_slice %78 {offsets = [0, 0, 64], sizes = [4, 8, 1], strides = [1, 1, 1]} : vector<4x8x65xf32> to vector<4x8x1xf32>
    %cst_45 = arith.constant 1.000000e-30 : f32
    %81 = vector.broadcast %cst_45 : f32 to vector<4x8x1xf32>
    %82 = arith.maximumf %80, %81 : vector<4x8x1xf32>
    %83 = tpu.reciprocal %82 {approx = true} : vector<4x8x1xf32> -> vector<4x8x1xf32>
    %84 = vector.broadcast %83 : vector<4x8x1xf32> to vector<4x8x64xf32>
    %85 = arith.mulf %79, %84 : vector<4x8x64xf32>
    %86 = vector.broadcast %36 : vector<4x8x1xf32> to vector<4x8x64xf32>
    %87 = arith.mulf %85, %86 : vector<4x8x64xf32>
    %cst_46 = arith.constant dense<0.000000e+00> : vector<4x64xf32>
    %88 = vector.multi_reduction <add>, %87, %cst_46 [1] : vector<4x8x64xf32> to vector<4x64xf32>
    %cst_47 = arith.constant 1.250000e-01 : f32
    %89 = vector.broadcast %cst_47 : f32 to vector<4x64xf32>
    %90 = arith.mulf %88, %89 : vector<4x64xf32>
    %91 = vector.shape_cast %90 : vector<4x64xf32> to vector<2x2x64xf32>
    %92 = vector.extract_strided_slice %91 {offsets = [0, 0, 0], sizes = [1, 2, 64], strides = [1, 1, 1]} : vector<2x2x64xf32> to vector<1x2x64xf32>
    %93 = vector.shape_cast %92 : vector<1x2x64xf32> to vector<2x64xf32>
    %94 = vector.extract_strided_slice %91 {offsets = [1, 0, 0], sizes = [1, 2, 64], strides = [1, 1, 1]} : vector<2x2x64xf32> to vector<1x2x64xf32>
    %95 = vector.shape_cast %94 : vector<1x2x64xf32> to vector<2x64xf32>
    %96 = tpu.concatenate %93, %95 in 1 : vector<2x64xf32>, vector<2x64xf32> -> vector<2x128xf32>
    %c0_48 = arith.constant 0 : index
    %c0_49 = arith.constant 0 : index
    %97 = vector.load %arg12[%c0_48, %c0_49] : memref<2x128xf32, #tpu.memory_space<vmem>>, vector<2x128xf32>
    tpu.vector_store %arg12[%c0_48, %c0_49], %96 {strides = array<i32>} : memref<2x128xf32, #tpu.memory_space<vmem>>, vector<2x128xf32>,
    return
  }
  func.func @transform_0(%arg0: i32) -> (i32, i32, i32) {
    %c0_i32 = arith.constant 0 : i32
    %c0_i32_0 = arith.constant 0 : i32
    %c0_i32_1 = arith.constant 0 : i32
    return %arg0, %c0_i32, %c0_i32_0 : i32, i32, i32
  }
  func.func @transform_1(%arg0: i32) -> (i32, i32, i32) {
    %c0_i32 = arith.constant 0 : i32
    %c0_i32_0 = arith.constant 0 : i32
    %c0_i32_1 = arith.constant 0 : i32
    return %arg0, %c0_i32, %c0_i32_0 : i32, i32, i32
  }
  func.func @transform_2(%arg0: i32) -> (i32, i32, i32, i32) {
    %c0_i32 = arith.constant 0 : i32
    %c0_i32_0 = arith.constant 0 : i32
    %c0_i32_1 = arith.constant 0 : i32
    %c0_i32_2 = arith.constant 0 : i32
    return %arg0, %c0_i32, %c0_i32_0, %c0_i32_1 : i32, i32, i32, i32
  }
  func.func @transform_3(%arg0: i32) -> (i32, i32, i32, i32) {
    %c0_i32 = arith.constant 0 : i32
    %c0_i32_0 = arith.constant 0 : i32
    %c0_i32_1 = arith.constant 0 : i32
    %c0_i32_2 = arith.constant 0 : i32
    return %arg0, %c0_i32, %c0_i32_0, %c0_i32_1 : i32, i32, i32, i32
  }
  func.func @transform_4(%arg0: i32) -> (i32, i32) {
    %c0_i32 = arith.constant 0 : i32
    %c0_i32_0 = arith.constant 0 : i32
    %c0_i32_1 = arith.constant 0 : i32
    return %c0_i32, %c0_i32_0 : i32, i32
  }
  func.func @transform_5(%arg0: i32) -> (i32, i32) {
    %c0_i32 = arith.constant 0 : i32
    %c0_i32_0 = arith.constant 0 : i32
    %c0_i32_1 = arith.constant 0 : i32
    return %c0_i32, %c0_i32_0 : i32, i32
  }
  func.func @transform_6(%arg0: i32) -> (i32, i32) {
    %c0_i32 = arith.constant 0 : i32
    %c0_i32_0 = arith.constant 0 : i32
    %c0_i32_1 = arith.constant 0 : i32
    return %c0_i32, %c0_i32_0 : i32, i32
  }
  func.func @transform_7(%arg0: i32) -> (i32, i32) {
    %c0_i32 = arith.constant 0 : i32
    %c0_i32_0 = arith.constant 0 : i32
    %c0_i32_1 = arith.constant 0 : i32
    return %c0_i32, %c0_i32_0 : i32, i32
  }
  func.func @transform_8(%arg0: i32) -> (i32, i32) {
    %c0_i32 = arith.constant 0 : i32
    %c0_i32_0 = arith.constant 0 : i32
    %c0_i32_1 = arith.constant 0 : i32
    return %c0_i32, %c0_i32_0 : i32, i32
  }
  func.func @transform_9(%arg0: i32) -> (i32, i32) {
    %c0_i32 = arith.constant 0 : i32
    %c0_i32_0 = arith.constant 0 : i32
    %c0_i32_1 = arith.constant 0 : i32
    return %c0_i32, %c0_i32_0 : i32, i32
  }
  func.func @transform_10(%arg0: i32) -> (i32, i32) {
    %c0_i32 = arith.constant 0 : i32
    %c0_i32_0 = arith.constant 0 : i32
    %c0_i32_1 = arith.constant 0 : i32
    return %c0_i32, %c0_i32_0 : i32, i32
  }
  func.func @transform_11(%arg0: i32) -> (i32, i32) {
    %c0_i32 = arith.constant 0 : i32
    %c0_i32_0 = arith.constant 0 : i32
    return %arg0, %c0_i32 : i32, i32
  }
}

</mosaic_0001>

<bundles_post_ra>
// kernel: model_v7_forward.1
= control target key start
LH: loop header
LB: loop body
LE: loop exit
PB: predicated region body
PF: predicated region fallthrough
CT: control target
= control target key end

     0   :  { %vm696_vm0 = vcmask 211968   ;;  %v4406_v13 = vmov 0.0   ;;  %s4394_s2 = inlined_call_operand.vmem [shape: bf16[2,8,8,26], index: 2, kind: input, shape index: {}]   ;;  %s4395_s4 = inlined_call_operand.vmem [shape: bf16[512,128], index: 4, kind: input, shape index: {}]   ;;  %s4396_s8 = inlined_call_operand.vmem [shape: f32[1,26], index: 8, kind: input, shape index: {}]   ;;  %s4397_s3 = inlined_call_operand.vmem [shape: bf16[2,8,8,26], index: 3, kind: input, shape index: {}]   ;;  %s4398_s0 = inlined_call_operand.vmem [shape: bf16[2,8,512], index: 0, kind: input, shape index: {}]   ;;  %s4399_s1 = inlined_call_operand.vmem [shape: bf16[2,8,512], index: 1, kind: input, shape index: {}]   ;;  %s4400_s5 = inlined_call_operand.vmem [shape: f32[1,128], index: 5, kind: input, shape index: {}]   ;;  %s4401_s6 = inlined_call_operand.vmem [shape: bf16[128,129], index: 6, kind: input, shape index: {}]   ;;  %s4402_s9 = inlined_call_operand.vmem [shape: f32[26,64], index: 9, kind: input, shape index: {}]   ;;  %s4403_s7 = inlined_call_operand.vmem [shape: f32[1,129], index: 7, kind: input, shape index: {}]   ;;  %s4404_s10 = inlined_call_operand.vmem [shape: f32[1,64], index: 10, kind: input, shape index: {}]   ;;  %s4405_s11 = inlined_call_operand.vmem [shape: f32[2,128], index: 11, kind: output, shape index: {}]  }
   0x1   :  { %v2689_v0 = vld [vmem:[%s4394_s2 + $0x10] sm:$0xff]   ;;  %v2688_v1 = vld [vmem:[%s4394_s2 + $0x8] sm:$0xff]   ;;  %v2625_v2 = vld [vmem:[%s4394_s2] sm:$0xff]  }
   0x2   :  { %v2875_v3 = vunpack.c.l.bf16 %v2689_v0  ;;  %v2877_v4 = vunpack.c.l.bf16 %v2688_v1  ;;  %v2879_v5 = vunpack.c.l.bf16 %v2625_v2  ;;  %v2599_v6 = vld [vmem:[%s4395_s4 + $0xb8] sm:$0xff]  ;;  %v2892_v9 = vunpack.c.h.bf16 %v2689_v0  ;;  %v2598_v12 = vld [vmem:[%s4395_s4 + $0xb0] sm:$0xff]  ;;  %v2925_v24 = vld [vmem:[%s4394_s2 + $0x20] sm:$0xff]  }
   0x3   :  { %v2583_v7 = vld [vmem:[%s4395_s4 + $0x38] sm:$0xff]  ;;  %v2894_v10 = vunpack.c.h.bf16 %v2688_v1  ;;  %384 = vmatpush.bf16.msra.mxu2 %v2599_v6  ;;  %v2582_v16 = vld [vmem:[%s4395_s4 + $0x30] sm:$0xff]  ;;  %v2920_v23 = vunpack.c.h.bf16 %v2625_v2  ;;  %v2597_v25 = vld [vmem:[%s4395_s4 + $0xa8] sm:$0xff]  ;;  %v2945_v32 = vunpack.c.l.bf16 %v2925_v24  ;;  %v3025_v2 = vunpack.c.h.bf16 %v2925_v24 }
   0x4   :  { %v2607_v8 = vld [vmem:[%s4395_s4 + $0xf8] sm:$0xff]  ;;  %vm636_vm1 = vcmp.eq.f32.partialorder %v2875_v3, -1.0  ;;  %vm634_vm2 = vcmp.eq.f32.partialorder %v2877_v4, -1.0  ;;  %346 = vmatpush.bf16.msra.mxu0 %v2583_v7  ;;  %vm632_vm3 = vcmp.eq.f32.partialorder %v2879_v5, -1.0  ;;  %v2606_v19 = vld [vmem:[%s4395_s4 + $0xf0] sm:$0xff]  ;;  %vm637_vm4 = vcmp.eq.f32.partialorder %v2892_v9, -1.0 }
   0x5   :  { %v2591_v11 = vld [vmem:[%s4395_s4 + $0x78] sm:$0xff]  ;;  %v668_v14 = vsel %vm636_vm1, 1.0, %v4406_v13  ;;  %v666_v15 = vsel %vm634_vm2, 1.0, %v4406_v13  ;;  %403 = vmatpush.bf16.msra.mxu3 %v2607_v8  ;;  %v2590_v20 = vld [vmem:[%s4395_s4 + $0x70] sm:$0xff]  ;;  %v664_v21 = vsel %vm632_vm3, 1.0, %v4406_v13  ;;  %vm635_vm5 = vcmp.eq.f32.partialorder %v2894_v10, -1.0 }
   0x6   :  { %v709_v17 = vsel %vm696_vm0, %v668_v14, inf  ;;  %v703_v18 = vsel %vm696_vm0, %v666_v15, inf  ;;  %365 = vmatpush.bf16.msra.mxu1 %v2591_v11  ;;  %v697_v22 = vsel %vm696_vm0, %v664_v21, inf  ;;  %v669_v26 = vsel %vm637_vm4, 1.0, %v4406_v13  ;;  %v2581_v27 = vld [vmem:[%s4395_s4 + $0x28] sm:$0xff]  ;;  %v2690_v29 = vld [vmem:[%s4394_s2 + $0x18] sm:$0xff]  }
   0x7   :  { %710 = vmin.xlane.f32.xlu2 %v709_v17  ;;  %704 = vmin.xlane.f32.xlu1 %v703_v18  ;;  %v667_v28 = vsel %vm635_vm5, 1.0, %v4406_v13  ;;  %v2605_v30 = vld [vmem:[%s4395_s4 + $0xe8] sm:$0xff]  ;;  %v712_v33 = vsel %vm696_vm0, %v669_v26, inf  ;;  %vm633_vm6 = vcmp.eq.f32.partialorder %v2920_v23, -1.0  ;;  %v2596_v35 = vld [vmem:[%s4395_s4 + $0xa0] sm:$0xff]  ;;  %v2954_v37 = vunpack.c.h.bf16 %v2690_v29  ;;  %v2595_v43 = vld [vmem:[%s4395_s4 + $0x98] sm:$0xff] }
   0x8   :  { %385 = vmatpush.bf16.msra.mxu2 %v2598_v12  ;;  %698 = vmin.xlane.f32.xlu0 %v697_v22  ;;  %v2589_v31 = vld [vmem:[%s4395_s4 + $0x68] sm:$0xff]  ;;  %v706_v34 = vsel %vm696_vm0, %v667_v28, inf  ;;  %v665_v36 = vsel %vm633_vm6, 1.0, %v4406_v13  ;;  %v2580_v38 = vld [vmem:[%s4395_s4 + $0x20] sm:$0xff]  ;;  %vm640_vm7 = vcmp.eq.f32.partialorder %v2945_v32, -1.0  ;;  %v2579_v45 = vld [vmem:[%s4395_s4 + $0x18] sm:$0xff]  ;;  %v2985_v49 = vunpack.c.l.bf16 %v2690_v29 }
   0x9   :  { %347 = vmatpush.bf16.msra.mxu0 %v2582_v16  ;;  %404 = vmatpush.bf16.msra.mxu3 %v2606_v19  ;;  %v700_v39 = vsel %vm696_vm0, %v665_v36, inf  ;;  %v2604_v40 = vld [vmem:[%s4395_s4 + $0xe0] sm:$0xff]  ;;  %v2692_v42 = vld [vmem:[%s4394_s2 + $0x28] sm:$0xff]   ;;  %v672_v44 = vsel %vm640_vm7, 1.0, %v4406_v13  ;;  %vm639_vm8 = vcmp.eq.f32.partialorder %v2954_v37, -1.0  ;;  %v2603_v47 = vld [vmem:[%s4395_s4 + $0xd8] sm:$0xff] }
   0xa   :  { %366 = vmatpush.bf16.msra.mxu1 %v2590_v20  ;;  %v2588_v41 = vld [vmem:[%s4395_s4 + $0x60] sm:$0xff]  ;;  %v671_v46 = vsel %vm639_vm8, 1.0, %v4406_v13  ;;  %v2587_v48 = vld [vmem:[%s4395_s4 + $0x58] sm:$0xff]  ;;  %v2987_v50 = vunpack.c.h.bf16 %v2692_v42  ;;  %v721_v51 = vsel %vm696_vm0, %v672_v44, inf  ;;  %v2991_v53 = vunpack.c.l.bf16 %v2692_v42  ;;  %v2594_v54 = vld [vmem:[%s4395_s4 + $0x90] sm:$0xff] }
   0xb   :  { %v718_v52 = vsel %vm696_vm0, %v671_v46, inf  ;;  %vm638_vm9 = vcmp.eq.f32.partialorder %v2985_v49, -1.0  ;;  %v2578_v55 = vld [vmem:[%s4395_s4 + $0x10] sm:$0xff]  ;;  %v2694_v61 = vld [vmem:[%s4394_s2 + $0x38] sm:$0xff]   ;;  %v2593_v62 = vld [vmem:[%s4395_s4 + $0x88] sm:$0xff]  ;;  %vm641_vm12 = vcmp.eq.f32.partialorder %v3025_v2, -1.0 }
   0xc   :  { %386 = vmatpush.bf16.msra.mxu2 %v2597_v25  ;;  %vm643_vm10 = vcmp.eq.f32.partialorder %v2987_v50, -1.0  ;;  %v670_v56 = vsel %vm638_vm9, 1.0, %v4406_v13  ;;  %v2602_v57 = vld [vmem:[%s4395_s4 + $0xd0] sm:$0xff]  ;;  %vm642_vm11 = vcmp.eq.f32.partialorder %v2991_v53, -1.0  ;;  %v2577_v1 = vld [vmem:[%s4395_s4 + $0x8] sm:$0xff]  ;;  %v3034_v11 = vunpack.c.l.bf16 %v2694_v61  ;;  %v2592_v16 = vld [vmem:[%s4395_s4 + $0x80] sm:$0xff] }
   0xd   :  { %348 = vmatpush.bf16.msra.mxu0 %v2581_v27  ;;  %405 = vmatpush.bf16.msra.mxu3 %v2605_v30  ;;  %v2586_v58 = vld [vmem:[%s4395_s4 + $0x50] sm:$0xff]  ;;  %v715_v59 = vsel %vm696_vm0, %v670_v56, inf  ;;  %v675_v60 = vsel %vm643_vm10, 1.0, %v4406_v13  ;;  %v674_v63 = vsel %vm642_vm11, 1.0, %v4406_v13  ;;  %v2601_v6 = vld [vmem:[%s4395_s4 + $0xc8] sm:$0xff]  ;;  %v673_v17 = vsel %vm641_vm12, 1.0, %v4406_v13 }
   0xe   :  { %367 = vmatpush.bf16.msra.mxu1 %v2589_v31  ;;  %v2693_v0 = vld [vmem:[%s4394_s2 + $0x30] sm:$0xff]   ;;  %v2585_v7 = vld [vmem:[%s4395_s4 + $0x48] sm:$0xff]  ;;  %v730_v8 = vsel %vm696_vm0, %v675_v60, inf  ;;  %v727_v12 = vsel %vm696_vm0, %v674_v63, inf  ;;  %v2576_v18 = vld [vmem:[%s4395_s4] sm:$0xff]  ;;  %v724_v19 = vsel %vm696_vm0, %v673_v17, inf }
   0xf   :  { %713 = vmin.xlane.f32.xlu2 %v712_v33  ;;  %707 = vmin.xlane.f32.xlu1 %v706_v34  ;;  %v3038_v14 = vunpack.c.h.bf16 %v2693_v0  ;;  %v3040_v15 = vunpack.c.l.bf16 %v2693_v0  ;;  %vm646_vm13 = vcmp.eq.f32.partialorder %v3034_v11, -1.0  ;;  %v2600_v20 = vld [vmem:[%s4395_s4 + $0xc0] sm:$0xff]  ;;  %v3074_v33 = vunpack.c.h.bf16 %v2694_v61  ;;  %v2695_v34 = vld [vmem:[%s4397_s3 + $0x8] sm:$0xff]   ;;  %v2570_v42 = vld [vmem:[%s4398_s0 + $0xc] sm:$0xf0] }
  0x10   :  { %387 = vmatpush.bf16.msra.mxu2 %v2596_v35  ;;  %701 = vmin.xlane.f32.xlu0 %v700_v39  ;;  %v2584_v21 = vld [vmem:[%s4395_s4 + $0x40] sm:$0xff]  ;;  %v678_v24 = vsel %vm646_vm13, 1.0, %v4406_v13  ;;  %v2313_v35 = vld [vmem:[%s4398_s0 + $0x8] sm:$0xf]  ;;  %v2571_v39 = vld [vmem:[%s4398_s0 + $0x14] sm:$0xf0] }
  0x11   :  { %349 = vmatpush.bf16.msra.mxu0 %v2580_v38  ;;  %406 = vmatpush.bf16.msra.mxu3 %v2604_v40  ;;  %v2657_v22 = vld [vmem:[%s4397_s3] sm:$0xff]   ;;  %vm645_vm14 = vcmp.eq.f32.partialorder %v3038_v14, -1.0  ;;  %vm644_vm15 = vcmp.eq.f32.partialorder %v3040_v15, -1.0  ;;  %v739_v28 = vsel %vm696_vm0, %v678_v24, inf  ;;  %vm647_vm3 = vcmp.eq.f32.partialorder %v3074_v33, -1.0 }
  0x12   :  { %368 = vmatpush.bf16.msra.mxu1 %v2588_v41  ;;  %v677_v25 = vsel %vm645_vm14, 1.0, %v4406_v13  ;;  %v3064_v26 = vunpack.c.h.bf16 %v2657_v22  ;;  %v676_v27 = vsel %vm644_vm15, 1.0, %v4406_v13  ;;  %v3069_v30 = vunpack.c.l.bf16 %v2657_v22  ;;  %v2305_v40 = vld [vmem:[%s4398_s0] sm:$0xf]  ;;  %v2315_v44 = vld [vmem:[%s4398_s0 + $0x18] sm:$0xf0] }
  0x13   :  { %v736_v29 = vsel %vm696_vm0, %v677_v25, inf  ;;  %v733_v31 = vsel %vm696_vm0, %v676_v27, inf  ;;  %v3091_v41 = vunpack.c.h.bf16 %v2695_v34  ;;  %v2573_v22 = vld [vmem:[%s4399_s1 + $0xc] sm:$0xf]  ;;  %v2331_v27 = vld [vmem:[%s4399_s1 + $0x18] sm:$0xf0] }
  0x14   :  { %388 = vmatpush.bf16.msra.mxu2 %v2595_v43  ;;  %vm649_vm1 = vcmp.eq.f32.partialorder %v3064_v26, -1.0  ;;  %vm648_vm2 = vcmp.eq.f32.partialorder %v3069_v30, -1.0  ;;  %v2569_v43 = vld [vmem:[%s4398_s0 + $0xc] sm:$0xf]  ;;  %vm2802_vm10 = vmmov 1  }
  0x15   :  { %350 = vmatpush.bf16.msra.mxu0 %v2579_v45  ;;  %407 = vmatpush.bf16.msra.mxu3 %v2603_v47  ;;  %v681_v36 = vsel %vm649_vm1, 1.0, %v4406_v13  ;;  %v680_v38 = vsel %vm648_vm2, 1.0, %v4406_v13  ;;  %v679_v45 = vsel %vm647_vm3, 1.0, %v4406_v13  ;;  %vm651_vm4 = vcmp.eq.f32.partialorder %v3091_v41, -1.0 }
  0x16   :  { %369 = vmatpush.bf16.msra.mxu1 %v2587_v48  ;;  %v748_v46 = vsel %vm696_vm0, %v681_v36, inf  ;;  %v745_v47 = vsel %vm696_vm0, %v680_v38, inf  ;;  %v3108_v48 = vld [vmem:[%s4396_s8] ss:$0 sm:$0xff]  ;;  %v742_v56 = vsel %vm696_vm0, %v679_v45, inf  ;;  %v683_v60 = vsel %vm651_vm4, 1.0, %v4406_v13 }
  0x17   :  { %722 = vmin.xlane.f32.xlu2 %v721_v51  ;;  %719 = vmin.xlane.f32.xlu1 %v718_v52  ;;  %v3110_v51 = vunpack.c.l.bf16 %v2695_v34  ;;  %v2314_v52 = vor.u32 %v2571_v39, %v2313_v35  ;;  %v754_v63 = vsel %vm696_vm0, %v683_v60, inf  ;;  %v930_v34 = vmul.f32 %v3108_v48, %v2892_v9 }
  0x18   :  { %389 = vmatpush.bf16.msra.mxu2 %v2594_v54  ;;  %716 = vmin.xlane.f32.xlu0 %v715_v59  ;;  %v2306_v54 = vor.u32 %v2570_v42, %v2305_v40  ;;  %v925_v59 = vmul.f32 %v3108_v48, %v2879_v5  ;;  %v931_v35 = vmul.f32 %v3108_v48, %v2985_v49 }
  0x19   :  { %351 = vmatpush.bf16.msra.mxu0 %v2578_v55  ;;  %408 = vmatpush.bf16.msra.mxu3 %v2602_v57  ;;  %v2318_v55 = vor.u32 %v2569_v43, %v2315_v44  ;;  %v2568_v57 = vld [vmem:[%s4398_s0 + $0x4] sm:$0xf]  ;;  %vm650_vm5 = vcmp.eq.f32.partialorder %v3110_v51, -1.0  ;;  %v929_v38 = vmul.f32 %v3108_v48, %v2875_v3  ;;  %v972_v39 = vsel %vm696_vm0, %v930_v34, 0.0 }
  0x1a   :  { %370 = vmatpush.bf16.msra.mxu1 %v2586_v58  ;;  %v2307_v58 = vld [vmem:[%s4398_s0 + $0x10] sm:$0xf0]  ;;  %v957_v0 = vsel %vm696_vm0, %v925_v59, 0.0  ;;  %v975_v40 = vsel %vm696_vm0, %v931_v35, 0.0  ;;  %v933_v43 = vmul.f32 %v3108_v48, %v2945_v32  ;;  %v934_v44 = vmul.f32 %v3108_v48, %v3025_v2 }
  0x1b   :  { %v2310_v61 = vor.u32 %v2568_v57, %v2307_v58  ;;  %v969_v42 = vsel %vm696_vm0, %v929_v38, 0.0  ;;  %v932_v45 = vmul.f32 %v3108_v48, %v2954_v37  ;;  %v939_v60 = vmul.f32 %v3108_v48, %v3034_v11 }
  0x1c   :  { %390 = vmatpush.bf16.msra.mxu2 %v2593_v62  ;;  %v682_v62 = vsel %vm650_vm5, 1.0, %v4406_v13  ;;  %vm1155_vm5 = vcmask 1041409  }
  0x1d   :  { %352 = vmatpush.bf16.msra.mxu0 %v2577_v1  ;;  %409 = vmatpush.bf16.msra.mxu3 %v2601_v6  ;;  %v751_v1 = vsel %vm696_vm0, %v682_v62, inf  ;;  %v927_v6 = vmul.f32 %v3108_v48, %v2877_v4  ;;  %v938_v62 = vmul.f32 %v3108_v48, %v3038_v14 }
  0x1e   :  { %371 = vmatpush.bf16.msra.mxu1 %v2585_v7  ;;  %v928_v7 = vmul.f32 %v3108_v48, %v2894_v10 }
  0x1f   :  { %731 = vmin.xlane.f32.xlu2 %v730_v8  ;;  %728 = vmin.xlane.f32.xlu1 %v727_v12  ;;  %v926_v8 = vmul.f32 %v3108_v48, %v2920_v23  ;;  %v2329_v12 = vld [vmem:[%s4399_s1 + $0x8] sm:$0xf]  ;;  %v963_v17 = vsel %vm696_vm0, %v927_v6, 0.0  ;;  %v942_v6 = vmul.f32 %v3108_v48, %v3064_v26 }
  0x20   :  { %391 = vmatpush.bf16.msra.mxu2 %v2592_v16  ;;  %725 = vmin.xlane.f32.xlu0 %v724_v19  ;;  %v2575_v16 = vld [vmem:[%s4399_s1 + $0x14] sm:$0xf0] }
  0x21   :  { %353 = vmatpush.bf16.msra.mxu0 %v2576_v18  ;;  %410 = vmatpush.bf16.msra.mxu3 %v2600_v20  ;;  %v966_v18 = vsel %vm696_vm0, %v928_v7, 0.0  ;;  %v2330_v19 = vor.u32 %v2575_v16, %v2329_v12  ;;  %v2321_v20 = vld [vmem:[%s4399_s1] sm:$0xf]  ;;  %v960_v24 = vsel %vm696_vm0, %v926_v8, 0.0  ;;  %v943_v7 = vmul.f32 %v3108_v48, %v3110_v51  ;;  %v2696_v8 = vld [vmem:[%s4397_s3 + $0x10] sm:$0xff]  }
  0x22   :  { %372 = vmatpush.bf16.msra.mxu1 %v2584_v21  ;;  %v2574_v21 = vld [vmem:[%s4399_s1 + $0xc] sm:$0xf0]  ;;  %v941_v12 = vmul.f32 %v3108_v48, %v3069_v30  ;;  %v1008_v16 = vsel %vm696_vm0, %v942_v6, 0.0 }
  0x23   :  { %392 = vmatmul.bf16.vlgmr.msra.gmra.mxu2 %v2314_v52  ;;  %v2322_v25 = vor.u32 %v2574_v21, %v2321_v20  ;;  %v978_v52 = vsel %vm696_vm0, %v932_v45, 0.0  ;;  %v1440_v20 = vsel %vm696_vm0, %v2875_v3, 0.0 }
  0x24   :  { %354 = vmatmul.bf16.vlgmr.msra.gmra.mxu0 %v2306_v54  ;;  %411 = vmatmul.bf16.vlgmr.msra.gmra.mxu3 %v2318_v55  ;;  %v936_v54 = vmul.f32 %v3108_v48, %v2987_v50  ;;  %v937_v55 = vmul.f32 %v3108_v48, %v3040_v15  ;;  %v1005_v21 = vsel %vm696_vm0, %v941_v12, 0.0  ;;  %v1489_v12 = vsel %vm696_vm0, %v2987_v50, 0.0  ;;  %v2700_v50 = vld [vmem:[%s4397_s3 + $0x30] sm:$0xff]  }
  0x25   :  { %373 = vmatmul.bf16.vlgmr.msra.gmra.mxu1 %v2310_v61  ;;  %v940_v61 = vmul.f32 %v3108_v48, %v3074_v33 }
  0x26   :  { %v990_v57 = vsel %vm696_vm0, %v936_v54, 0.0  ;;  %v993_v58 = vsel %vm696_vm0, %v937_v55, 0.0  ;;  %v2699_v55 = vld [vmem:[%s4397_s3 + $0x28] sm:$0xff]  }
  0x27   :  { %740 = vmin.xlane.f32.xlu2 %v739_v28  ;;  %737 = vmin.xlane.f32.xlu1 %v736_v29  ;;  %v2334_v28 = vor.u32 %v2573_v22, %v2331_v27  ;;  %v2572_v29 = vld [vmem:[%s4399_s1 + $0x4] sm:$0xf] }
  0x28   :  { %734 = vmin.xlane.f32.xlu0 %v733_v31  ;;  %v2323_v31 = vld [vmem:[%s4399_s1 + $0x10] sm:$0xf0]  ;;  %v2698_v22 = vld [vmem:[%s4397_s3 + $0x20] sm:$0xff]  }
  0x29   :  { %v2326_v36 = vor.u32 %v2572_v29, %v2323_v31  ;;  %v2697_v29 = vld [vmem:[%s4397_s3 + $0x18] sm:$0xff]   ;;  %v944_v31 = vmul.f32 %v3108_v48, %v3091_v41  ;;  %v3231_v34 = vunpack.c.l.bf16 %v2698_v22 }
  0x2a   :  { %v3235_v38 = vunpack.c.h.bf16 %v2697_v29 }
  0x2b   :  { %vm656_vm6 = vcmp.eq.f32.partialorder %v3231_v34, -1.0 }
  0x2f   :  { %749 = vmin.xlane.f32.xlu2 %v748_v46  ;;  %746 = vmin.xlane.f32.xlu1 %v745_v47  ;;  %v981_v46 = vsel %vm696_vm0, %v933_v43, 0.0  ;;  %v984_v47 = vsel %vm696_vm0, %v934_v44, 0.0  ;;  %v1014_v43 = vsel %vm696_vm0, %v944_v31, 0.0  ;;  %v3243_v44 = vunpack.c.l.bf16 %v2697_v29 }
  0x30   :  { %743 = vmin.xlane.f32.xlu0 %v742_v56  ;;  %v935_v56 = vmul.f32 %v3108_v48, %v2991_v53 }
  0x31   :  { %4420 = vst [vmem:[#allocation4_spill] sm:$0xff] %v3243_v44 }
  0x32   :  { %v987_v59 = vsel %vm696_vm0, %v935_v56, 0.0 }
  0x33   :  { %397 = vmatmul.bf16.gmra.mxu2 %v2330_v19  ;;  %v3210_v19 = vunpack.c.h.bf16 %v2696_v8 }
  0x34   :  { %359 = vmatmul.bf16.gmra.mxu0 %v2322_v25  ;;  %416 = vmatmul.bf16.gmra.mxu3 %v2334_v28  ;;  %v1412_v25 = vsel %vm696_vm0, %v2879_v5, 0.0  ;;  %v1441_v28 = vrot.slane %v1440_v20, 4 }
  0x35   :  { %378 = vmatmul.bf16.gmra.mxu1 %v2326_v36  ;;  %4419 = vst [vmem:[#allocation3_spill] sm:$0xff] %v3210_v19  ;;  %v946_v3 = vmul.f32 %v3108_v48, %v3210_v19  ;;  %v1413_v35 = vrot.slane %v1412_v25, 4 }
  0x37   :  { %755 = vmin.xlane.f32.xlu1 %v754_v63  ;;  %958 = vadd.xlane.f32.xlu2 %v957_v0  ;;  %v999_v63 = vsel %vm696_vm0, %v939_v60, 0.0  ;;  %v1002_v0 = vsel %vm696_vm0, %v940_v61, 0.0  ;;  %v1020_v36 = vsel %vm696_vm0, %v946_v3, 0.0 }
  0x38   :  { %752 = vmin.xlane.f32.xlu0 %v751_v1  ;;  %v996_v1 = vsel %vm696_vm0, %v938_v62, 0.0 }
  0x3f   :  { %964 = vadd.xlane.f32.xlu1 %v963_v17  ;;  %967 = vadd.xlane.f32.xlu2 %v966_v18  ;;  %v1011_v17 = vsel %vm696_vm0, %v943_v7, 0.0  ;;  %v3208_v18 = vunpack.c.l.bf16 %v2696_v8 }
  0x40   :  { %961 = vadd.xlane.f32.xlu0 %v960_v24  ;;  %v1426_v24 = vsel %vm696_vm0, %v2877_v4, 0.0 }
  0x41   :  { %4418 = vst [vmem:[#allocation2_spill] sm:$0xff] %v3208_v18  ;;  %v945_v27 = vmul.f32 %v3108_v48, %v3208_v18  ;;  %v1427_v4 = vrot.slane %v1426_v24, 4 }
  0x43   :  { %v1017_v5 = vsel %vm696_vm0, %v945_v27, 0.0  ;;  %v1428_v45 = vadd.f32 %v1427_v4, %v1426_v24  ;;  %v1490_v27 = vrot.slane %v1489_v12, 4  ;;  %v949_v4 = vmul.f32 %v3108_v48, %v3231_v34 }
  0x47   :  { %973 = vadd.xlane.f32.xlu1 %v972_v39  ;;  %976 = vadd.xlane.f32.xlu2 %v975_v40  ;;  %v1442_v39 = vadd.f32 %v1441_v28, %v1440_v20  ;;  %v1433_v40 = vsel %vm696_vm0, %v2894_v10, 0.0 }
  0x48   :  { %970 = vadd.xlane.f32.xlu0 %v969_v42  ;;  %v1419_v42 = vsel %vm696_vm0, %v2920_v23, 0.0  ;;  %v1434_v10 = vrot.slane %v1433_v40, 4  ;;  %v688_v23 = vsel %vm656_vm6, 1.0, %v4406_v13  ;;  %vm1157_vm6 = vcmask 1042434  }
  0x49   :  { %v1420_v54 = vrot.slane %v1419_v42, 4  ;;  %v1443_v56 = vrot.slane %v1442_v39, 2  ;;  %v769_v61 = vsel %vm696_vm0, %v688_v23, inf  ;;  %v3297_v23 = vunpack.c.h.bf16 %v2699_v55 }
  0x4b   :  { %v1421_v6 = vadd.f32 %v1420_v54, %v1419_v42  ;;  %v3263_v7 = vadd.f32 %v1443_v56, %v1442_v39  ;;  %v3282_v39 = vsel %vm696_vm0, %v2954_v37, 0.0  ;;  %v1482_v54 = vsel %vm696_vm0, %v2991_v53, 0.0  ;;  %4424 = vst [vmem:[#allocation8_spill] sm:$0xff] %v3297_v23 }
  0x4c   :  { %v1029_v37 = vsel %vm696_vm0, %v949_v4, 0.0 }
  0x4f   :  { %982 = vadd.xlane.f32.xlu1 %v981_v46  ;;  %985 = vadd.xlane.f32.xlu2 %v984_v47  ;;  %v1414_v46 = vadd.f32 %v1413_v35, %v1412_v25  ;;  %v1468_v47 = vsel %vm696_vm0, %v2945_v32, 0.0  ;;  %v1447_v32 = vsel %vm696_vm0, %v2892_v9, 0.0  ;;  %v1422_v25 = vrot.slane %v1421_v6, 2 }
  0x50   :  { %979 = vadd.xlane.f32.xlu0 %v978_v52  ;;  %v948_v52 = vmul.f32 %v3108_v48, %v3235_v38  ;;  %v1469_v60 = vrot.slane %v1468_v47, 4  ;;  %v1448_v8 = vrot.slane %v1447_v32, 4 }
  0x52   :  { %v1026_v62 = vsel %vm696_vm0, %v948_v52, 0.0  ;;  %v1470_v20 = vadd.f32 %v1469_v60, %v1468_v47  ;;  %v3276_v28 = vadd.f32 %v1448_v8, %v1447_v32  ;;  %v3292_v52 = vadd.f32 %v1422_v25, %v1421_v6  ;;  %v2701_v32 = vld [vmem:[%s4397_s3 + $0x38] sm:$0xff]  }
  0x53   :  { %v3379_v25 = vsel %vm696_vm0, %v3034_v11, 0.0 }
  0x54   :  { %v1424_v8 = vrot.slane %v3292_v52, 1 }
  0x57   :  { %991 = vadd.xlane.f32.xlu1 %v990_v57  ;;  %994 = vadd.xlane.f32.xlu2 %v993_v58  ;;  %v947_v57 = vmul.f32 %v3108_v48, %v3243_v44  ;;  %v1429_v58 = vrot.slane %v1428_v45, 2 }
  0x58   :  { %988 = vadd.xlane.f32.xlu0 %v987_v59  ;;  %v1415_v59 = vrot.slane %v1414_v46, 2 }
  0x59   :  { %v1430_v9 = vadd.f32 %v1429_v58, %v1428_v45  ;;  %v3286_v45 = vunpack.c.l.bf16 %v2700_v50  ;;  %v3304_v58 = vsel %vm696_vm0, %v2985_v49, 0.0 }
  0x5b   :  { %v1431_v35 = vrot.slane %v1430_v9, 1  ;;  %4423 = vst [vmem:[#allocation7_spill] sm:$0xff] %v3286_v45  ;;  %v953_v53 = vmul.f32 %v3108_v48, %v3286_v45 }
  0x5d   :  { %v3313_v60 = vadd.f32 %v1431_v35, %v1430_v9 }
  0x5f   :  { %1000 = vadd.xlane.f32.xlu1 %v999_v63  ;;  %1003 = vadd.xlane.f32.xlu2 %v1002_v0  ;;  %v3259_v63 = vunpack.c.h.bf16 %v2698_v22  ;;  %v3261_v0 = vunpack.c.l.bf16 %v2699_v55 }
  0x60   :  { %997 = vadd.xlane.f32.xlu0 %v996_v1  ;;  %v1435_v1 = vadd.f32 %v1434_v10, %v1433_v40  ;;  %v1491_v10 = vadd.f32 %v1490_v27, %v1489_v12  ;;  %v1475_v12 = vsel %vm696_vm0, %v3025_v2, 0.0 }
  0x61   :  { %4421 = vst [vmem:[#allocation5_spill] sm:$0xff] %v3259_v63  ;;  %v951_v22 = vmul.f32 %v3108_v48, %v3261_v0  ;;  %v1476_v4 = vrot.slane %v1475_v12, 4 }
  0x62   :  { %4422 = vst [vmem:[#allocation6_spill] sm:$0xff] %v3261_v0  ;;  %v1436_v24 = vrot.slane %v1435_v1, 2 }
  0x64   :  { %v3290_v47 = vadd.f32 %v1436_v24, %v1435_v1 }
  0x66   :  { %v1438_v6 = vrot.slane %v3290_v47, 1 }
  0x67   :  { %1009 = vadd.xlane.f32.xlu1 %v1008_v16  ;;  %1012 = vadd.xlane.f32.xlu2 %v1011_v17  ;;  %v1023_v16 = vsel %vm696_vm0, %v947_v57, 0.0  ;;  %v1416_v17 = vadd.f32 %v1415_v59, %v1414_v46  ;;  %v3288_v46 = vunpack.c.h.bf16 %v2700_v50  ;;  %v1483_v59 = vrot.slane %v1482_v54, 4 }
  0x68   :  { %1006 = vadd.xlane.f32.xlu0 %v1005_v21  ;;  %v950_v21 = vmul.f32 %v3108_v48, %v3259_v63  ;;  %v1041_v50 = vsel %vm696_vm0, %v953_v53, 0.0 }
  0x69   :  { %v954_v55 = vmul.f32 %v3108_v48, %v3288_v46  ;;  %v3342_v24 = vadd.f32 %v1483_v59, %v1482_v54 }
  0x6a   :  { %v1032_v42 = vsel %vm696_vm0, %v950_v21, 0.0  ;;  %v1455_v21 = vrot.slane %v3304_v58, 4 }
  0x6f   :  { %1018 = vadd.xlane.f32.xlu1 %v1017_v5  ;;  %1021 = vadd.xlane.f32.xlu2 %v1020_v36  ;;  %v1417_v5 = vrot.slane %v1416_v17, 1  ;;  %v1471_v36 = vrot.slane %v1470_v20, 2 }
  0x70   :  { %1015 = vadd.xlane.f32.xlu0 %v1014_v43  ;;  %v1035_v43 = vsel %vm696_vm0, %v951_v22, 0.0  ;;  %v3339_v22 = vunpack.c.h.bf16 %v2701_v32 }
  0x71   :  { %v3300_v57 = vadd.f32 %v1471_v36, %v1470_v20  ;;  %v952_v20 = vmul.f32 %v3108_v48, %v3297_v23 }
  0x73   :  { %v1473_v2 = vrot.slane %v3300_v57, 1 }
  0x77   :  { %770 = vmin.xlane.f32.xlu1 %v769_v61  ;;  %1027 = vadd.xlane.f32.xlu2 %v1026_v62  ;;  %v3315_v61 = vadd.f32 %v1417_v5, %v1416_v17  ;;  %v1492_v62 = vrot.slane %v1491_v10, 2 }
  0x78   :  { %1024 = vadd.xlane.f32.xlu0 %v1023_v16 }
  0x7a   :  { %v711_v29 = vpop.xlane.xlu2 %710  ;;  %v705_v31 = vpop.xlane.xlu1 %704 }
  0x7b   :  { %v699_v40 = vpop.xlane.xlu0 %698  ;;  %vm797_vm7 = vcmp.gt.f32.partialorder %v711_v29, 0.0  ;;  %vm795_vm9 = vcmp.gt.f32.partialorder %v705_v31, 0.0  ;;  %v1044_v29 = vsel %vm696_vm0, %v954_v55, 0.0  ;;  %v3351_v31 = vadd.f32 %v1492_v62, %v1491_v10 }
  0x7c   :  { %vm793_vm8 = vcmp.gt.f32.partialorder %v699_v40, 0.0  ;;  %vm3320_vm11 = vmxor %vm797_vm7, %vm2802_vm10  ;;  %v1038_v40 = vsel %vm696_vm0, %v952_v20, 0.0  ;;  %v956_v10 = vmul.f32 %v3108_v48, %v3339_v22  ;;  %v1477_v55 = vadd.f32 %v1476_v4, %v1475_v12 }
  0x7d   :  { %vm3330_vm12 = vmxor %vm793_vm8, %vm2802_vm10  ;;  %v2531_v54 = vsel %vm3320_vm11, 1.0, %v4406_v13  ;;  %vm1159_vm7 = vcmask 1043459   ;;  %vm1161_vm8 = vcmask 1044484   ;;  %vm1163_vm11 = vcmask 1045509  }
  0x7e   :  { %vm830_vm13 = vmxor %vm795_vm9, %vm2802_vm10  ;;  %v2527_v35 = vsel %vm3330_vm12, 1.0, %v4406_v13 }
  0x7f   :  { %1033 = vadd.xlane.f32.xlu1 %v1032_v42  ;;  %1036 = vadd.xlane.f32.xlu2 %v1035_v43  ;;  %v2529_v5 = vsel %vm830_vm13, 1.0, %v4406_v13  ;;  %v3361_v42 = vunpack.c.l.bf16 %v2701_v32  ;;  %v2155_v59 = vperm.slane %v2527_v35, 0 }
  0x80   :  { %1030 = vadd.xlane.f32.xlu0 %v1029_v37  ;;  %v2157_v62 = vperm.slane %v2529_v5, 0  ;;  %v1050_v5 = vsel %vm696_vm0, %v956_v10, 0.0  ;;  %v1531_v10 = vsel %vm696_vm0, %v3064_v26, 0.0 }
  0x81   :  { %v955_v1 = vmul.f32 %v3108_v48, %v3361_v42 }
  0x82   :  { %v714_v9 = vpop.xlane.xlu2 %713  ;;  %v708_v17 = vpop.xlane.xlu1 %707 }
  0x83   :  { %vm798_vm14 = vcmp.gt.f32.partialorder %v714_v9, 0.0  ;;  %vm796_vm15 = vcmp.gt.f32.partialorder %v708_v17, 0.0  ;;  %v702_v27 = vpop.xlane.xlu0 %701  ;;  %v1485_v9 = vrot.slane %v3342_v24, 2  ;;  %v1047_v11 = vsel %vm696_vm0, %v955_v1, 0.0 }
  0x84   :  { %vm3345_vm1 = vmxor %vm798_vm14, %vm2802_vm10  ;;  %vm794_vm3 = vcmp.gt.f32.partialorder %v702_v27, 0.0  ;;  %v1532_v1 = vrot.slane %v1531_v10, 4 }
  0x85   :  { %vm831_vm2 = vmxor %vm796_vm15, %vm2802_vm10  ;;  %v2532_v32 = vsel %vm3345_vm1, 1.0, %v4406_v13 }
  0x86   :  { %v2530_v36 = vsel %vm831_vm2, 1.0, %v4406_v13  ;;  %vm829_vm4 = vmxor %vm794_vm3, %vm2802_vm10  ;;  %vm4417_vm2 = vcmask 1046534  }
  0x87   :  { %v2528_v43 = vsel %vm829_vm4, 1.0, %v4406_v13  ;;  %1042 = vadd.xlane.f32.xlu1 %v1041_v50  ;;  %1045 = vadd.xlane.f32.xlu2 %v1044_v29  ;;  %v2158_v37 = vperm.slane %v2530_v36, 0  ;;  %v2159_v50 = vperm.slane %v2531_v54, 0  ;;  %v2160_v29 = vperm.slane %v2532_v32, 0  ;;  %v2622_v32 = vld [vmem:[%s4401_s6 + $0x74] sm:$0xf] }
  0x88   :  { %v2156_v53 = vperm.slane %v2528_v43, 0  ;;  %1039 = vadd.xlane.f32.xlu0 %v1038_v40  ;;  %v1478_v36 = vrot.slane %v1477_v55, 2  ;;  %v1496_v40 = vsel %vm696_vm0, %v3040_v15, 0.0  ;;  %v3397_v15 = vadd.f32 %v1438_v6, %v3290_v47  ;;  %v2523_v47 = vld [vmem:[%s4401_s6 + $0x78] sm:$0xf0] }
  0x89   :  { %vm4416_vm4 = vcmask 1047559   ;;  %v1497_v6 = vrot.slane %v1496_v40, 4 }
  0x8a   :  { %v2219_v17 = vsel %vm1155_vm5, %v2156_v53, %v2155_v59  ;;  %v723_v20 = vpop.xlane.xlu2 %722  ;;  %v720_v27 = vpop.xlane.xlu1 %719  ;;  %v3402_v53 = vadd.f32 %v1424_v8, %v3292_v52  ;;  %v3418_v52 = vsel %vm696_vm0, %v3038_v14, 0.0  ;;  %v1524_v8 = vsel %vm696_vm0, %v3069_v30, 0.0 }
  0x8b   :  { %v2220_v12 = vsel %vm1157_vm6, %v2157_v62, %v2219_v17  ;;  %vm800_vm9 = vcmp.gt.f32.partialorder %v720_v27, 0.0  ;;  %v717_v35 = vpop.xlane.xlu0 %716  ;;  %vm801_vm13 = vcmp.gt.f32.partialorder %v723_v20, 0.0  ;;  %v2526_v17 = vor.u32 %v2622_v32, %v2523_v47 }
  0x8c   :  { %v2221_v4 = vsel %vm1159_vm7, %v2158_v37, %v2220_v12  ;;  %vm835_vm14 = vmxor %vm800_vm9, %vm2802_vm10  ;;  %vm799_vm15 = vcmp.gt.f32.partialorder %v717_v35, 0.0  ;;  %v3434_v35 = vadd.f32 %v1478_v36, %v1477_v55  ;;  %v1538_v36 = vsel %vm696_vm0, %v3110_v51, 0.0  ;;  %v2623_v51 = vld [vmem:[%s4401_s6 + $0x74] sm:$0xf0] }
  0x8d   :  { %v2222_v48 = vsel %vm1161_vm8, %v2159_v50, %v2221_v4  ;;  %v2534_v43 = vsel %vm835_vm14, 1.0, %v4406_v13  ;;  %vm834_vm1 = vmxor %vm799_vm15, %vm2802_vm10  ;;  %549 = vmatpush.bf16.msrb.mxu1 %v2526_v17  ;;  %v3432_v4 = vadd.f32 %v1485_v9, %v3342_v24  ;;  %v1545_v9 = vsel %vm696_vm0, %v3091_v41, 0.0  ;;  %v2521_v41 = vld [vmem:[%s4401_s6 + $0x70] sm:$0xf] }
  0x8e   :  { %v2223_v54 = vsel %vm1163_vm11, %v2160_v29, %v2222_v48  ;;  %v2162_v37 = vperm.slane %v2534_v43, 0  ;;  %v2533_v59 = vsel %vm834_vm1, 1.0, %v4406_v13  ;;  %vm3406_vm3 = vmxor %vm801_vm13, %vm2802_vm10  ;;  %v1525_v48 = vrot.slane %v1524_v8, 4 }
  0x8f   :  { %1051 = vadd.xlane.f32.xlu1 %v1050_v5  ;;  %v2161_v26 = vperm.slane %v2533_v59, 0  ;;  %v2535_v14 = vsel %vm3406_vm3, 1.0, %v4406_v13  ;;  %v1504_v5 = vrot.slane %v3418_v52, 4  ;;  %v1533_v32 = vadd.f32 %v1532_v1, %v1531_v10 }
  0x90   :  { %1048 = vadd.xlane.f32.xlu0 %v1047_v11  ;;  %v2620_v11 = vld [vmem:[%s4401_s6 + $0x64] sm:$0xf]  ;;  %v1526_v17 = vadd.f32 %v1525_v48, %v1524_v8  ;;  %v1487_v10 = vrot.slane %v3432_v4, 1  ;;  %v1480_v1 = vrot.slane %v3434_v35, 1  ;;  %v1539_v8 = vrot.slane %v1538_v36, 4 }
  0x91   :  { %v2224_v29 = vsel %vm4417_vm2, %v2161_v26, %v2223_v54  ;;  %v2515_v54 = vld [vmem:[%s4401_s6 + $0x68] sm:$0xf0]  ;;  %v2163_v26 = vperm.slane %v2535_v14, 0  ;;  %v1546_v14 = vrot.slane %v1545_v9, 4  ;;  %v1580_v48 = vsel %vm696_vm0, %v3231_v34, 0.0 }
  0x92   :  { %v732_v50 = vpop.xlane.xlu2 %731  ;;  %v729_v12 = vpop.xlane.xlu1 %728  ;;  %v3429_v30 = vsel %vm4416_vm4, %v2162_v37, %v2224_v29  ;;  %v3444_v37 = vadd.f32 %v1497_v6, %v1496_v40  ;;  %v2518_v55 = vor.u32 %v2620_v11, %v2515_v54  ;;  %v3457_v40 = vadd.f32 %v1455_v21, %v3304_v58  ;;  %v2618_v58 = vld [vmem:[%s4401_s6 + $0x54] sm:$0xf]  ;;  %v2507_v21 = vld [vmem:[%s4401_s6 + $0x58] sm:$0xf0]  ;;  %v2621_v34 = vld [vmem:[%s4401_s6 + $0x64] sm:$0xf0] }
  0x93   :  { %vm804_vm9 = vcmp.gt.f32.partialorder %v732_v50, 0.0  ;;  %vm803_vm13 = vcmp.gt.f32.partialorder %v729_v12, 0.0  ;;  %4433 = vst [vmem:[#allocation9_spill] sm:$0xff] %v3429_v30  ;;  %v726_v43 = vpop.xlane.xlu0 %725  ;;  %v2522_v29 = vor.u32 %v2623_v51, %v2521_v41  ;;  %v2513_v41 = vld [vmem:[%s4401_s6 + $0x60] sm:$0xf]  ;;  %v1527_v51 = vrot.slane %v1526_v17, 2 }
  0x94   :  { %vm838_vm14 = vmxor %vm804_vm9, %vm2802_vm10  ;;  %vm802_vm1 = vcmp.gt.f32.partialorder %v726_v43, 0.0  ;;  %550 = vmatpush.bf16.msrb.mxu1 %v2518_v55  ;;  %v2510_v43 = vor.u32 %v2618_v58, %v2507_v21  ;;  %v1499_v11 = vrot.slane %v3444_v37, 2  ;;  %v1547_v58 = vadd.f32 %v1546_v14, %v1545_v9 }
  0x95   :  { %v2538_v24 = vsel %vm838_vm14, 1.0, %v4406_v13  ;;  %vm837_vm15 = vmxor %vm803_vm13, %vm2802_vm10  ;;  %530 = vmatpush.bf16.msrb.mxu0 %v2522_v29  ;;  %v2499_v29 = vld [vmem:[%s4401_s6 + $0x48] sm:$0xf0]  ;;  %v3510_v9 = vadd.f32 %v1504_v5, %v3418_v52  ;;  %v2614_v52 = vld [vmem:[%s4401_s6 + $0x34] sm:$0xf] }
  0x96   :  { %v2537_v59 = vsel %vm837_vm15, 1.0, %v4406_v13  ;;  %vm836_vm9 = vmxor %vm802_vm1, %vm2802_vm10  ;;  %v2166_v50 = vperm.slane %v2538_v24, 0 }
  0x97   :  { %v2165_v47 = vperm.slane %v2537_v59, 0  ;;  %v2536_v6 = vsel %vm836_vm9, 1.0, %v4406_v13  ;;  %v3481_v59 = vadd.f32 %v1473_v2, %v3300_v57 }
  0x98   :  { %v2164_v12 = vperm.slane %v2536_v6, 0  ;;  %551 = vmatpush.bf16.msrb.mxu1 %v2510_v43 }
  0x9a   :  { %v2226_v54 = vsel %vm1155_vm5, %v2164_v12, %v2163_v26  ;;  %v741_v24 = vpop.xlane.xlu2 %740  ;;  %v738_v55 = vpop.xlane.xlu1 %737  ;;  %v1534_v26 = vrot.slane %v1533_v32, 2  ;;  %v2514_v12 = vor.u32 %v2621_v34, %v2513_v41  ;;  %v2619_v41 = vld [vmem:[%s4401_s6 + $0x54] sm:$0xf0] }
  0x9b   :  { %v2227_v6 = vsel %vm1157_vm6, %v2165_v47, %v2226_v54  ;;  %vm807_vm13 = vcmp.gt.f32.partialorder %v741_v24, 0.0  ;;  %vm806_vm14 = vcmp.gt.f32.partialorder %v738_v55, 0.0  ;;  %v735_v2 = vpop.xlane.xlu0 %734  ;;  %v2616_v47 = vld [vmem:[%s4401_s6 + $0x44] sm:$0xf]  ;;  %v1540_v54 = vadd.f32 %v1539_v8, %v1538_v36  ;;  %v2505_v8 = vld [vmem:[%s4401_s6 + $0x50] sm:$0xf] }
  0x9c   :  { %vm841_vm15 = vmxor %vm807_vm13, %vm2802_vm10  ;;  %v2228_v57 = vsel %vm1159_vm7, %v2166_v50, %v2227_v6  ;;  %vm805_vm9 = vcmp.gt.f32.partialorder %v735_v2, 0.0  ;;  %v2502_v43 = vor.u32 %v2616_v47, %v2499_v29  ;;  %v1552_v50 = vsel %vm696_vm0, %v3208_v18, 0.0  ;;  %531 = vmatpush.bf16.msrb.mxu0 %v2514_v12 }
  0x9d   :  { %v2541_v21 = vsel %vm841_vm15, 1.0, %v4406_v13  ;;  %vm840_vm1 = vmxor %vm806_vm14, %vm2802_vm10  ;;  %v1581_v24 = vrot.slane %v1580_v48, 4  ;;  %v3505_v6 = vadd.f32 %v1487_v10, %v3432_v4  ;;  %v1559_v4 = vsel %vm696_vm0, %v3210_v19, 0.0 }
  0x9e   :  { %v2540_v55 = vsel %vm840_vm1, 1.0, %v4406_v13  ;;  %vm839_vm13 = vmxor %vm805_vm9, %vm2802_vm10  ;;  %552 = vmatpush.bf16.msrb.mxu1 %v2502_v43  ;;  %v2169_v10 = vperm.slane %v2541_v21, 0  ;;  %v2506_v2 = vor.u32 %v2619_v41, %v2505_v8  ;;  %v1535_v5 = vadd.f32 %v1534_v26, %v1533_v32  ;;  %v2491_v43 = vld [vmem:[%s4401_s6 + $0x38] sm:$0xf0]  ;;  %v2497_v32 = vld [vmem:[%s4401_s6 + $0x40] sm:$0xf] }
  0x9f   :  { %v2168_v14 = vperm.slane %v2540_v55, 0  ;;  %v2539_v36 = vsel %vm839_vm13, 1.0, %v4406_v13  ;;  %v1528_v12 = vadd.f32 %v1527_v51, %v1526_v17  ;;  %v1548_v47 = vrot.slane %v1547_v58, 2  ;;  %v2617_v17 = vld [vmem:[%s4401_s6 + $0x44] sm:$0xf0] }
  0xa0   :  { %v2167_v34 = vperm.slane %v2539_v36, 0  ;;  %v1587_v29 = vsel %vm696_vm0, %v3259_v63, 0.0  ;;  %v1541_v55 = vrot.slane %v1540_v54, 2  ;;  %v1553_v20 = vrot.slane %v1552_v50, 4  ;;  %532 = vmatpush.bf16.msrb.mxu0 %v2506_v2 }
  0xa1   :  { %v2494_v41 = vor.u32 %v2614_v52, %v2491_v43  ;;  %v1560_v27 = vrot.slane %v1559_v4, 4  ;;  %v1582_v3 = vadd.f32 %v1581_v24, %v1580_v48  ;;  %v1588_v51 = vrot.slane %v1587_v29, 4  ;;  %v2612_v48 = vld [vmem:[%s4401_s6 + $0x24] sm:$0xf]  ;;  %v2483_v24 = vld [vmem:[%s4401_s6 + $0x28] sm:$0xf0] }
  0xa2   :  { %v2229_v21 = vsel %vm1161_vm8, %v2167_v34, %v2228_v57  ;;  %v750_v36 = vpop.xlane.xlu2 %749  ;;  %v747_v8 = vpop.xlane.xlu1 %746  ;;  %v2498_v34 = vor.u32 %v2617_v17, %v2497_v32  ;;  %v1536_v52 = vrot.slane %v1535_v5, 1  ;;  %v1529_v43 = vrot.slane %v1528_v12, 1 }
  0xa3   :  { %vm810_vm14 = vcmp.gt.f32.partialorder %v750_v36, 0.0  ;;  %v2230_v26 = vsel %vm1163_vm11, %v2168_v14, %v2229_v21  ;;  %vm809_vm15 = vcmp.gt.f32.partialorder %v747_v8, 0.0  ;;  %v744_v57 = vpop.xlane.xlu0 %743  ;;  %553 = vmatpush.bf16.msrb.mxu1 %v2494_v41  ;;  %v2486_v21 = vor.u32 %v2612_v48, %v2483_v24 }
  0xa4   :  { %v2231_v2 = vsel %vm4417_vm2, %v2169_v10, %v2230_v26  ;;  %vm3545_vm1 = vmxor %vm810_vm14, %vm2802_vm10  ;;  %vm808_vm9 = vcmp.gt.f32.partialorder %v744_v57, 0.0  ;;  %v3552_v36 = vadd.f32 %v1480_v1, %v3434_v35  ;;  %v3555_v32 = vadd.f32 %v1548_v47, %v1547_v58  ;;  %533 = vmatpush.bf16.msrb.mxu0 %v2498_v34  ;;  %v2489_v10 = vld [vmem:[%s4401_s6 + $0x30] sm:$0xf]  ;;  %v2615_v26 = vld [vmem:[%s4401_s6 + $0x34] sm:$0xf0] }
  0xa5   :  { %v1542_v17 = vadd.f32 %v1541_v55, %v1540_v54  ;;  %vm842_vm13 = vmxor %vm808_vm9, %vm2802_vm10  ;;  %v1554_v57 = vadd.f32 %v1553_v20, %v1552_v50  ;;  %v3564_v48 = vadd.f32 %v1560_v27, %v1559_v4  ;;  %v2490_v58 = vor.u32 %v2615_v26, %v2489_v10  ;;  %v2610_v20 = vld [vmem:[%s4401_s6 + $0x14] sm:$0xf]  ;;  %v2475_v27 = vld [vmem:[%s4401_s6 + $0x18] sm:$0xf0] }
  0xa6   :  { %vm3568_vm14 = vmxor %vm809_vm15, %vm2802_vm10  ;;  %v2542_v1 = vsel %vm842_vm13, 1.0, %v4406_v13  ;;  %v3576_v54 = vadd.f32 %v1499_v11, %v3444_v37  ;;  %v1583_v47 = vrot.slane %v1582_v3, 2  ;;  %v1589_v55 = vadd.f32 %v1588_v51, %v1587_v29  ;;  %v2481_v10 = vld [vmem:[%s4401_s6 + $0x20] sm:$0xf] }
  0xa7   :  { %v2170_v34 = vperm.slane %v2542_v1, 0  ;;  %554 = vmatpush.bf16.msrb.mxu1 %v2486_v21  ;;  %v3584_v50 = vadd.f32 %v1536_v52, %v1535_v5  ;;  %v3586_v4 = vadd.f32 %v1529_v43, %v1528_v12  ;;  %v2544_v37 = vsel %vm3545_vm1, 1.0, %v4406_v13  ;;  %v3598_v5 = vld [vmem:[%s4400_s5] ss:$0 sm:$0xff] }
  0xa8   :  { %v2478_v11 = vor.u32 %v2610_v20, %v2475_v27  ;;  %v1543_v8 = vrot.slane %v1542_v17, 1  ;;  %v2543_v21 = vsel %vm3568_vm14, 1.0, %v4406_v13  ;;  %534 = vmatpush.bf16.msrb.mxu0 %v2490_v58  ;;  %v1555_v52 = vrot.slane %v1554_v57, 2  ;;  %v2608_v27 = vld [vmem:[%s4401_s6 + $0x4] sm:$0xf] }
  0xa9   :  { %v3601_v12 = vsel %vm4416_vm4, %v2170_v34, %v2231_v2  ;;  %v3606_v14 = vsel %vm696_vm0, %v3243_v44, 0.0  ;;  %v3611_v26 = vadd.f32 %v1583_v47, %v1582_v3  ;;  %v1590_v1 = vrot.slane %v1589_v55, 2  ;;  %v2613_v34 = vld [vmem:[%s4401_s6 + $0x24] sm:$0xf0]  ;;  %v355_v3 = vpop.f32.mrf.mxu0 }
  0xaa   :  { %v756_v51 = vpop.xlane.xlu1 %755  ;;  %v959_v24 = vpop.xlane.xlu2 %958  ;;  %4438 = vst [vmem:[#allocation10_spill] sm:$0xff] %v3601_v12  ;;  %v2172_v20 = vperm.slane %v2544_v37, 0  ;;  %v1121_v2 = vlaneseq  ;;  %v2171_v29 = vperm.slane %v2543_v21, 0  ;;  %v2482_v47 = vor.u32 %v2613_v34, %v2481_v10  ;;  %v2467_v37 = vld [vmem:[%s4401_s6 + $0x8] sm:$0xf0] }
  0xab   :  { %vm812_vm15 = vcmp.gt.f32.partialorder %v756_v51, 0.0  ;;  %v753_v58 = vpop.xlane.xlu0 %752  ;;  %555 = vmatpush.bf16.msrb.mxu1 %v2478_v11  ;;  %v3627_v43 = vsel %vm696_vm0, %v3261_v0, 0.0  ;;  %v356_v41 = vadd.f32 %v3598_v5, %v355_v3  ;;  %v2470_v56 = vor.u32 %v2608_v27, %v2467_v37  ;;  %v2473_v34 = vld [vmem:[%s4401_s6 + $0x10] sm:$0xf]  ;;  %v2611_v11 = vld [vmem:[%s4401_s6 + $0x14] sm:$0xf0]  ;;  %v374_v37 = vpop.f32.mrf.mxu1 }
  0xac   :  { %vm845_vm1 = vmxor %vm812_vm15, %vm2802_vm10  ;;  %vm811_vm9 = vcmp.gt.f32.partialorder %v753_v58, 0.0  ;;  %v3631_v49 = vadd.f32 %v1543_v8, %v1542_v17  ;;  %v3633_v21 = vadd.f32 %v1555_v52, %v1554_v57  ;;  %535 = vmatpush.bf16.msrb.mxu0 %v2482_v47  ;;  %v3644_v3 = vsel %vm696_vm0, %v3286_v45, 0.0 }
  0xad   :  { %v2546_v51 = vsel %vm845_vm1, 1.0, %v4406_v13  ;;  %vm844_vm13 = vmxor %vm811_vm9, %vm2802_vm10  ;;  %v3646_v17 = vand.u32 127, %v1121_v2  ;;  %v2474_v8 = vor.u32 %v2611_v11, %v2473_v34  ;;  %v3649_v27 = vadd.f32 %v1590_v1, %v1589_v55 }
  0xae   :  { %v2174_v10 = vperm.slane %v2546_v51, 0  ;;  %v2545_v58 = vsel %vm844_vm13, 1.0, %v4406_v13  ;;  %v3653_v51 = vsel %vm3330_vm12, %v959_v24, -1e+30  ;;  %v2233_v47 = vsel %vm1155_vm5, %v2172_v20, %v2171_v29  ;;  %v393_v13 = vpop.f32.mrf.mxu2  ;;  %v412_v29 = vpop.f32.mrf.mxu3  ;;  %v2465_v20 = vld [vmem:[%s4401_s6] sm:$0xf] }
  0xaf   :  { %v2173_v57 = vperm.slane %v2545_v58, 0  ;;  %556 = vmatpush.bf16.msrb.mxu1 %v2470_v56  ;;  %v1595_v12 = vrot.slane %v3627_v43, 4  ;;  %v3659_v2 = vsel %vm696_vm0, %v3297_v23, 0.0  ;;  %v375_v55 = vadd.f32 %v374_v37, %v356_v41 }
  0xb0   :  { %536 = vmatpush.bf16.msrb.mxu0 %v2474_v8  ;;  %v4439_v34 = vrot.slane %v3282_v39, 4  ;;  %v1123_v41 = vperm.slane %v3653_v51, %v3646_v17  ;;  %v4441_v1 = vrot.slane %v3276_v28, 2  ;;  %vm1708_vm15 = vcmask 1041408  }
  0xb1   :  { %v2234_v56 = vsel %vm1157_vm6, %v2173_v57, %v2233_v47  ;;  %v394_v8 = vadd.f32 %v393_v13, %v375_v55  ;;  %v1457_v13 = vrot.slane %v3457_v40, 2  ;;  %v1602_v63 = vrot.slane %v3659_v2, 4 }
  0xb2   :  { %v965_v11 = vpop.xlane.xlu1 %964  ;;  %v968_v58 = vpop.xlane.xlu2 %967  ;;  %v1463_v52 = vadd.f32 %v4439_v34, %v3282_v39  ;;  %v3674_v57 = vsel %vm1159_vm7, %v2174_v10, %v2234_v56  ;;  %v1451_v39 = vadd.f32 %v4441_v1, %v3276_v28  ;;  %v1638_v1 = vld [vmem:[%s4402_s9 + $0x10] sm:$0xff]  ;;  %vm1194_vm1 = vcmask 64512  }
  0xb3   :  { %v3665_v24 = vsel %vm3330_vm12, %v965_v11, -1e+30  ;;  %4440 = vst [vmem:[#allocation11_spill] sm:$0xff] %v3674_v57  ;;  %v3680_v47 = vsel %vm3330_vm12, %v968_v58, -1e+30  ;;  %v962_v37 = vpop.xlane.xlu0 %961  ;;  %v357_v56 = vpop.f32.mrf.mxu0  ;;  %v1458_v44 = vadd.f32 %v1457_v13, %v3457_v40  ;;  %v413_v19 = vadd.f32 %v412_v29, %v394_v8 }
  0xb4   :  { %v2609_v11 = vld [vmem:[%s4401_s6 + $0x4] sm:$0xf0]  ;;  %v3690_v10 = vsel %vm3330_vm12, %v962_v37, -1e+30  ;;  %v1639_v58 = vld [vmem:[%s4402_s9 + $0x18] sm:$0x3]  ;;  %v1125_v55 = vperm.slane %v3665_v24, %v3646_v17  ;;  %v358_v28 = vadd.f32 %v3598_v5, %v357_v56  ;;  %v1672_v56 = vsel %vm1155_vm5, %v3402_v53, %v3315_v61  ;;  %v376_v23 = vpop.f32.mrf.mxu1 }
  0xb5   :  { %v2466_v34 = vor.u32 %v2609_v11, %v2465_v20  ;;  %v1124_v57 = vperm.slane %v3690_v10, %v3646_v17  ;;  %2559 = vmatpush.msk.msrb.mxu2 %vm1708_vm15, %v1639_v58  ;;  %v1452_v20 = vrot.slane %v1451_v39, 1  ;;  %v1637_v37 = vld [vmem:[%s4402_s9 + $0x8] sm:$0xff]  ;;  %v4442_v11 = vrot.slane %v3263_v7, 1 }
  0xb6   :  { %v1464_v45 = vrot.slane %v1463_v52, 2  ;;  %v1673_v18 = vsel %vm1157_vm6, %v3313_v60, %v1672_v56  ;;  %v395_v0 = vpop.f32.mrf.mxu2  ;;  %v1459_v40 = vrot.slane %v1458_v44, 1  ;;  %v3724_v53 = vadd.f32 %v1595_v12, %v3627_v43 }
  0xb7   :  { %537 = vmatpush.bf16.msrb.mxu0 %v2466_v34  ;;  %v1446_v30 = vadd.f32 %v4442_v11, %v3263_v7  ;;  %v1156_v58 = vsel %vm1155_vm5, %v1124_v57, %v1123_v41  ;;  %1725 = vmatpush.msrb.mxu2 %v1638_v1  ;;  %v1453_v34 = vadd.f32 %v1452_v20, %v1451_v39  ;;  %v1636_v7 = vld [vmem:[%s4402_s9] sm:$0xff]  ;;  %v414_v1 = vpop.f32.mrf.mxu3  ;;  %vm1749_vm9 = vcmask 1048064  }
  0xb8   :  { %v1465_v13 = vadd.f32 %v1464_v45, %v1463_v52  ;;  %v1674_v61 = vsel %vm1159_vm7, %v3397_v15, %v1673_v18  ;;  %v1126_v29 = vperm.slane %v3680_v47, %v3646_v17  ;;  %v377_v41 = vadd.f32 %v376_v23, %v358_v28 }
  0xb9   :  { %1726 = vmatpush.msrb.mxu2 %v1637_v37  ;;  %v1675_v8 = vsel %vm1161_vm8, %v1446_v30, %v1674_v61  ;;  %v1158_v39 = vsel %vm1157_vm6, %v1125_v55, %v1156_v58  ;;  %v1460_v20 = vadd.f32 %v1459_v40, %v1458_v44  ;;  %v4443_v18 = vrot.slane %v3379_v25, 4 }
  0xba   :  { %v974_v60 = vpop.xlane.xlu1 %973  ;;  %v977_v57 = vpop.xlane.xlu2 %976  ;;  %v1466_v45 = vrot.slane %v1465_v13, 1  ;;  %v422_v52 = vmax.f32 %v413_v19, 0.0  ;;  %v396_v11 = vadd.f32 %v395_v0, %v377_v41  ;;  %v1676_v23 = vsel %vm1163_vm11, %v1453_v34, %v1675_v8 }
  0xbb   :  { %v1512_v15 = vadd.f32 %v4443_v18, %v3379_v25  ;;  %v3735_v12 = vsel %vm3330_vm12, %v974_v60, -1e+30  ;;  %v971_v43 = vpop.xlane.xlu0 %970  ;;  %1727 = vmatpush.msrb.mxu2 %v1636_v7  ;;  %v1677_v55 = vsel %vm4417_vm2, %v1460_v20, %v1676_v23  ;;  %v1501_v28 = vrot.slane %v3576_v54, 1  ;;  %v360_v25 = vpop.f32.mrf.mxu0 }
  0xbc   :  { %v3740_v30 = vsel %vm3330_vm12, %v971_v43, -1e+30  ;;  %v1467_v44 = vadd.f32 %v1466_v45, %v1465_v13  ;;  %v1160_v37 = vsel %vm1159_vm7, %v1126_v29, %v1158_v39  ;;  %v415_v19 = vadd.f32 %v414_v1, %v396_v11  ;;  %v379_v45 = vpop.f32.mrf.mxu1 }
  0xbd   :  { %v1127_v56 = vperm.slane %v3740_v30, %v3646_v17  ;;  %v4444_v0 = vrot.slane %v3510_v9, 2  ;;  %v1128_v34 = vperm.slane %v3735_v12, %v3646_v17  ;;  %v1513_v40 = vrot.slane %v1512_v15, 2 }
  0xbe   :  { %v1678_v7 = vsel %vm4416_vm4, %v1467_v44, %v1677_v55  ;;  %v1517_v13 = vsel %vm696_vm0, %v3074_v33, 0.0  ;;  %v423_v61 = vmax.f32 %v415_v19, 0.0  ;;  %v4445_v29 = vrot.slane %v3351_v31, 1  ;;  %v398_v33 = vpop.f32.mrf.mxu2 }
  0xbf   :  { %v1507_v58 = vadd.f32 %v4444_v0, %v3510_v9  ;;  %2560 = vmatmul.msk.f32.vlgmr.msrb.gmra.mxu2 %vm696_vm0, %v1678_v7  ;;  %v1518_v8 = vrot.slane %v1517_v13, 4  ;;  %v1162_v9 = vsel %vm1161_vm8, %v1127_v56, %v1160_v37  ;;  %v1502_v39 = vadd.f32 %v1501_v28, %v3576_v54  ;;  %v417_v19 = vpop.f32.mrf.mxu3 }
  0xc0   :  { %v1495_v60 = vadd.f32 %v4445_v29, %v3351_v31  ;;  %v1514_v1 = vadd.f32 %v1513_v40, %v1512_v15  ;;  %v1679_v20 = vsel %vm1155_vm5, %v3552_v36, %v3481_v59  ;;  %v3766_v18 = vsel %vm3330_vm12, %v977_v57, -1e+30 }
  0xc1   :  { %v1508_v41 = vrot.slane %v1507_v58, 1  ;;  %v426_v31 = vpack.c.bf16 %v423_v61, %v422_v52  ;;  %v1519_v44 = vadd.f32 %v1518_v8, %v1517_v13  ;;  %v4446_v55 = vrot.slane %v3644_v3, 4 }
  0xc2   :  { %v983_v43 = vpop.xlane.xlu1 %982  ;;  %v986_v11 = vpop.xlane.xlu2 %985  ;;  %v1603_v15 = vadd.f32 %v1602_v63, %v3659_v2  ;;  %v1515_v28 = vrot.slane %v1514_v1, 1  ;;  %v1680_v59 = vsel %vm1157_vm6, %v3505_v6, %v1679_v20  ;;  %v1615_v36 = vsel %vm696_vm0, %v3288_v46, 0.0 }
  0xc3   :  { %v1509_v23 = vadd.f32 %v1508_v41, %v1507_v58  ;;  %v3771_v54 = vadd.f32 %v4446_v55, %v3644_v3  ;;  %v980_v57 = vpop.xlane.xlu0 %979  ;;  %v1164_v37 = vsel %vm1163_vm11, %v1128_v34, %v1162_v9  ;;  %557 = vmatmul.bf16.vlgmr.msrb.gmra.mxu1 %v426_v31  ;;  %538 = vmatmul.bf16.vlgmr.msrb.gmra.mxu0 %v426_v31  ;;  %v1520_v52 = vrot.slane %v1519_v44, 2  ;;  %v362_v0 = vpop.f32.mrf.mxu0 }
  0xc4   :  { %v1681_v56 = vsel %vm1159_vm7, %v1495_v60, %v1680_v59  ;;  %v1129_v3 = vperm.slane %v3766_v18, %v3646_v17  ;;  %v3784_v63 = vsel %vm3330_vm12, %v980_v57, -1e+30  ;;  %v1516_v6 = vadd.f32 %v1515_v28, %v1514_v1  ;;  %v381_v20 = vpop.f32.mrf.mxu1 }
  0xc5   :  { %v1682_v2 = vsel %vm1161_vm8, %v1502_v39, %v1681_v56  ;;  %v1130_v58 = vperm.slane %v3784_v63, %v3646_v17  ;;  %v1521_v34 = vadd.f32 %v1520_v52, %v1519_v44  ;;  %v361_v61 = vadd.f32 %v3598_v5, %v360_v25 }
  0xc6   :  { %v1683_v7 = vsel %vm1163_vm11, %v1509_v23, %v1682_v2  ;;  %v1166_v40 = vsel %vm4417_vm2, %v1129_v3, %v1164_v37  ;;  %v363_v16 = vadd.f32 %v3598_v5, %v362_v0  ;;  %v3796_v29 = vsel %vm3406_vm3, %v983_v43, -1e+30  ;;  %v400_v5 = vpop.f32.mrf.mxu2 }
  0xc7   :  { %v1684_v13 = vsel %vm4417_vm2, %v1516_v6, %v1683_v7  ;;  %v3800_v60 = vsel %vm3406_vm3, %v986_v11, -1e+30  ;;  %v1168_v41 = vsel %vm4416_vm4, %v1130_v58, %v1166_v40  ;;  %v1522_v8 = vrot.slane %v1521_v34, 1  ;;  %v419_v2 = vpop.f32.mrf.mxu3 }
  0xc8   :  { %v1592_v9 = vrot.slane %v3649_v27, 1  ;;  %v1597_v39 = vrot.slane %v3724_v53, 2  ;;  %v1195_v1 = vsel %vm1194_vm1, %v1168_v41, -inf  ;;  %v380_v25 = vadd.f32 %v379_v45, %v361_v61 }
  0xc9   :  { %v1604_v31 = vrot.slane %v1603_v15, 2  ;;  %v1616_v23 = vrot.slane %v1615_v36, 4  ;;  %1196 = vmax.xlane.f32.xlu2 %v1195_v1  ;;  %v1523_v55 = vadd.f32 %v1522_v8, %v1521_v34  ;;  %v382_v11 = vadd.f32 %v381_v20, %v363_v16 }
  0xca   :  { %v992_v43 = vpop.xlane.xlu1 %991  ;;  %v995_v44 = vpop.xlane.xlu2 %994  ;;  %v1131_v28 = vperm.slane %v3796_v29, %v3646_v17  ;;  %v1132_v59 = vperm.slane %v3800_v60, %v3646_v17  ;;  %v399_v45 = vadd.f32 %v398_v33, %v380_v25  ;;  %v1611_v37 = vrot.slane %v3771_v54, 2 }
  0xcb   :  { %v3812_v57 = vsel %vm3406_vm3, %v992_v43, -1e+30  ;;  %v3817_v52 = vsel %vm696_vm0, %v3361_v42, 0.0  ;;  %v989_v56 = vpop.xlane.xlu0 %988  ;;  %v1685_v3 = vsel %vm4416_vm4, %v1523_v55, %v1684_v13  ;;  %v401_v6 = vadd.f32 %v400_v5, %v382_v11 }
  0xcc   :  { %v3821_v0 = vadd.f32 %v1597_v39, %v3724_v53  ;;  %v1134_v58 = vperm.slane %v3812_v57, %v3646_v17  ;;  %v3827_v33 = vsel %vm3406_vm3, %v989_v56, -1e+30  ;;  %2561 = vmatmul.msk.f32.gmra.mxu2 %vm696_vm0, %v1685_v3  ;;  %v418_v34 = vadd.f32 %v417_v19, %v399_v45 }
  0xcd   :  { %v3830_v7 = vadd.f32 %v1604_v31, %v1603_v15  ;;  %v3832_v40 = vadd.f32 %v1616_v23, %v1615_v36  ;;  %v1133_v13 = vperm.slane %v3827_v33, %v3646_v17  ;;  %v420_v61 = vadd.f32 %v419_v2, %v401_v6 }
  0xce   :  { %v1169_v53 = vsel %vm1155_vm5, %v1132_v59, %v1131_v28  ;;  %v3839_v16 = vsel %vm3406_vm3, %v995_v44, -1e+30  ;;  %v424_v41 = vmax.f32 %v418_v34, 0.0  ;;  %v1573_v8 = vsel %vm696_vm0, %v3235_v38, 0.0 }
  0xcf   :  { %v1623_v19 = vrot.slane %v3817_v52, 4  ;;  %v1170_v15 = vsel %vm1157_vm6, %v1133_v13, %v1169_v53  ;;  %v425_v36 = vmax.f32 %v420_v61, 0.0  ;;  %v1574_v39 = vrot.slane %v1573_v8, 4 }
  0xd0   :  { %v1599_v1 = vrot.slane %v3821_v0, 1  ;;  %v3847_v25 = vadd.f32 %v1611_v37, %v3771_v54  ;;  %v1171_v20 = vsel %vm1159_vm7, %v1134_v58, %v1170_v15  ;;  %v4447_v5 = vrot.slane %v3606_v14, 4 }
  0xd1   :  { %v1606_v23 = vrot.slane %v3830_v7, 1  ;;  %v1135_v43 = vperm.slane %v3839_v16, %v3646_v17  ;;  %v427_v11 = vpack.c.bf16 %v425_v36, %v424_v41  ;;  %v1575_v28 = vadd.f32 %v1574_v39, %v1573_v8 }
  0xd2   :  { %v1568_v31 = vadd.f32 %v4447_v5, %v3606_v14  ;;  %v1001_v44 = vpop.xlane.xlu1 %1000  ;;  %v1004_v55 = vpop.xlane.xlu2 %1003  ;;  %v1618_v59 = vrot.slane %v3832_v40, 2  ;;  %v4448_v6 = vrot.slane %v3564_v48, 2  ;;  %v1557_v61 = vrot.slane %v3633_v21, 1 }
  0xd3   :  { %v3859_v54 = vsel %vm3406_vm3, %v1001_v44, -1e+30  ;;  %v3863_v45 = vsel %vm3406_vm3, %v1004_v55, -1e+30  ;;  %v998_v56 = vpop.xlane.xlu0 %997  ;;  %v1172_v3 = vsel %vm1161_vm8, %v1135_v43, %v1171_v20  ;;  %562 = vmatmul.bf16.gmra.mxu1 %v427_v11  ;;  %543 = vmatmul.bf16.gmra.mxu0 %v427_v11  ;;  %v1576_v58 = vrot.slane %v1575_v28, 2 }
  0xd4   :  { %v1569_v14 = vrot.slane %v1568_v31, 2  ;;  %v1137_v37 = vperm.slane %v3859_v54, %v3646_v17  ;;  %v1563_v2 = vadd.f32 %v4448_v6, %v3564_v48  ;;  %v1138_v34 = vperm.slane %v3863_v45, %v3646_v17 }
  0xd5   :  { %v3875_v13 = vsel %vm3406_vm3, %v998_v56, -1e+30  ;;  %v4449_v8 = vrot.slane %v3555_v32, 1  ;;  %v1577_v48 = vadd.f32 %v1576_v58, %v1575_v28  ;;  %v1558_v39 = vadd.f32 %v1557_v61, %v3633_v21 }
  0xd6   :  { %v1570_v53 = vadd.f32 %v1569_v14, %v1568_v31  ;;  %v1136_v41 = vperm.slane %v3875_v13, %v3646_v17  ;;  %v1564_v36 = vrot.slane %v1563_v2, 1  ;;  %v1686_v62 = vsel %vm1155_vm5, %v3584_v50, %v3586_v4 }
  0xd7   :  { %v1551_v15 = vadd.f32 %v4449_v8, %v3555_v32  ;;  %v1629_v5 = vsel %vm696_vm0, %v3339_v22, 0.0  ;;  %v1578_v44 = vrot.slane %v1577_v48, 1  ;;  %v1687_v55 = vsel %vm1157_vm6, %v3631_v49, %v1686_v62 }
  0xd8   :  { %v1571_v20 = vrot.slane %v1570_v53, 1  ;;  %v1173_v31 = vsel %vm1163_vm11, %v1136_v41, %v1172_v3  ;;  %v1565_v43 = vadd.f32 %v1564_v36, %v1563_v2  ;;  %v1624_v28 = vadd.f32 %v1623_v19, %v3817_v52 }
  0xd9   :  { %v1174_v32 = vsel %vm4417_vm2, %v1137_v37, %v1173_v31  ;;  %v1688_v21 = vsel %vm1159_vm7, %v1551_v15, %v1687_v55  ;;  %v1579_v4 = vadd.f32 %v1578_v44, %v1577_v48  ;;  %v1630_v3 = vrot.slane %v1629_v5, 4 }
  0xda   :  { %v1572_v11 = vadd.f32 %v1571_v20, %v1570_v53  ;;  %v1010_v14 = vpop.xlane.xlu1 %1009  ;;  %v1013_v56 = vpop.xlane.xlu2 %1012  ;;  %v1175_v50 = vsel %vm4416_vm4, %v1138_v34, %v1174_v32  ;;  %v1689_v6 = vsel %vm1161_vm8, %v1558_v39, %v1688_v21  ;;  %v4450_v2 = vrot.slane %v3611_v26, 1 }
  0xdb   :  { %v1593_v49 = vadd.f32 %v1592_v9, %v3649_v27  ;;  %v1198_v37 = vsel %vm1194_vm1, %v1175_v50, -inf  ;;  %v1690_v52 = vsel %vm1163_vm11, %v1565_v43, %v1689_v6  ;;  %v1600_v19 = vadd.f32 %v1599_v1, %v3821_v0  ;;  %v1007_v34 = vpop.xlane.xlu0 %1006 }
  0xdc   :  { %v1586_v58 = vadd.f32 %v4450_v2, %v3611_v26  ;;  %1199 = vmax.xlane.f32.xlu0 %v1198_v37  ;;  %v1691_v61 = vsel %vm4417_vm2, %v1572_v11, %v1690_v52  ;;  %v1619_v53 = vadd.f32 %v1618_v59, %v3832_v40  ;;  %v3910_v41 = vsel %vm3568_vm14, %v1010_v14, -1e+30 }
  0xdd   :  { %v1692_v26 = vsel %vm4416_vm4, %v1579_v4, %v1691_v61  ;;  %v1613_v27 = vrot.slane %v3847_v25, 1  ;;  %v1625_v9 = vrot.slane %v1624_v28, 2  ;;  %v3916_v8 = vsel %vm3568_vm14, %v1007_v34, -1e+30 }
  0xde   :  { %2562 = vmatmul.msk.f32.gmra.mxu2 %vm696_vm0, %v1692_v26  ;;  %v1607_v0 = vadd.f32 %v1606_v23, %v3830_v7  ;;  %v1620_v1 = vrot.slane %v1619_v53, 1  ;;  %v1631_v15 = vadd.f32 %v1630_v3, %v1629_v5  ;;  %v1693_v36 = vsel %vm1155_vm5, %v1593_v49, %v1586_v58 }
  0xdf   :  { %v1614_v40 = vadd.f32 %v1613_v27, %v3847_v25  ;;  %v1626_v59 = vadd.f32 %v1625_v9, %v1624_v28  ;;  %v3924_v48 = vsel %vm3568_vm14, %v1013_v56, -1e+30  ;;  %v1694_v62 = vsel %vm1157_vm6, %v1600_v19, %v1693_v36 }
  0xe0   :  { %v1621_v39 = vadd.f32 %v1620_v1, %v1619_v53  ;;  %v1632_v20 = vrot.slane %v1631_v15, 2  ;;  %v1140_v31 = vperm.slane %v3910_v41, %v3646_v17  ;;  %v1139_v7 = vperm.slane %v3916_v8, %v3646_v17 }
  0xe1   :  { %v1627_v23 = vrot.slane %v1626_v59, 1  ;;  %v1695_v25 = vsel %vm1159_vm7, %v1607_v0, %v1694_v62  ;;  %v1141_v21 = vperm.slane %v3924_v48, %v3646_v17 }
  0xe2   :  { %v1019_v5 = vpop.xlane.xlu1 %1018  ;;  %v1022_v43 = vpop.xlane.xlu2 %1021  ;;  %v1633_v44 = vadd.f32 %v1632_v20, %v1631_v15  ;;  %v1696_v55 = vsel %vm1161_vm8, %v1614_v40, %v1695_v25  ;;  %v1176_v56 = vsel %vm1155_vm5, %v1140_v31, %v1139_v7 }
  0xe3   :  { %v1628_v32 = vadd.f32 %v1627_v23, %v1626_v59  ;;  %v1697_v11 = vsel %vm1163_vm11, %v1621_v39, %v1696_v55  ;;  %v1016_v28 = vpop.xlane.xlu0 %1015  ;;  %v3939_v50 = vsel %vm3568_vm14, %v1019_v5, -1e+30  ;;  %v1177_v49 = vsel %vm1157_vm6, %v1141_v21, %v1176_v56 }
  0xe4   :  { %v1634_v14 = vrot.slane %v1633_v44, 1  ;;  %v3943_v4 = vsel %vm3568_vm14, %v1016_v28, -1e+30  ;;  %v1143_v58 = vperm.slane %v3939_v50, %v3646_v17  ;;  %v3956_v19 = vsel %vm3568_vm14, %v1022_v43, -1e+30 }
  0xe5   :  { %v1698_v6 = vsel %vm4417_vm2, %v1628_v32, %v1697_v11  ;;  %v1142_v3 = vperm.slane %v3943_v4, %v3646_v17  ;;  %v1144_v9 = vperm.slane %v3956_v19, %v3646_v17 }
  0xe6   :  { %v1635_v2 = vadd.f32 %v1634_v14, %v1633_v44 }
  0xe7   :  { %v1178_v52 = vsel %vm1159_vm7, %v1142_v3, %v1177_v49 }
  0xe8   :  { %v1699_v37 = vsel %vm4416_vm4, %v1635_v2, %v1698_v6  ;;  %v1179_v27 = vsel %vm1161_vm8, %v1143_v58, %v1178_v52 }
  0xe9   :  { %2563 = vmatmul.msk.f32.gmra.mxu2 %vm696_vm0, %v1699_v37  ;;  %v1180_v40 = vsel %vm1163_vm11, %v1144_v9, %v1179_v27 }
  0xea   :  { %v771_v34 = vpop.xlane.xlu1 %770  ;;  %v1028_v61 = vpop.xlane.xlu2 %1027 }
  0xeb   :  { %v3960_v53 = vsel %vm3568_vm14, %v1028_v61, -1e+30  ;;  %v1025_v26 = vpop.xlane.xlu0 %1024  ;;  %vm817_vm12 = vcmp.gt.f32.partialorder %v771_v34, 0.0 }
  0xec   :  { %v1146_v0 = vperm.slane %v3960_v53, %v3646_v17  ;;  %v3969_v1 = vsel %vm3568_vm14, %v1025_v26, -1e+30  ;;  %vm3976_vm3 = vmxor %vm817_vm12, %vm2802_vm10  ;;  %vm1371_vm14 = vcmask 7168  }
  0xed   :  { %v1145_v15 = vperm.slane %v3969_v1, %v3646_v17 }
  0xef   :  { %v1181_v59 = vsel %vm4417_vm2, %v1145_v15, %v1180_v40 }
  0xf0   :  { %v1182_v39 = vsel %vm4416_vm4, %v1146_v0, %v1181_v59 }
  0xf1   :  { %v1201_v20 = vsel %vm1194_vm1, %v1182_v39, -inf  ;;  %v2803_v39 = vmov 0  }
  0xf2   :  { %v1034_v35 = vpop.xlane.xlu1 %1033  ;;  %1202 = vmax.xlane.f32.xlu1 %v1201_v20  ;;  %v1037_v62 = vpop.xlane.xlu2 %1036  ;;  %2709 = vset.pattern.permute.xlu2 %v2803_v39 }
  0xf3   :  { %v3984_v31 = vsel %vm3976_vm3, %v1034_v35, -1e+30  ;;  %v1031_v7 = vpop.xlane.xlu0 %1030  ;;  %v3996_v43 = vsel %vm3976_vm3, %v1037_v62, -1e+30  ;;  %2708 = vset.pattern.permute.xlu1 %v2803_v39  ;;  %2707 = vset.pattern.permute.xlu0 %v2803_v39 }
  0xf4   :  { %v3988_v23 = vsel %vm3976_vm3, %v1031_v7, -1e+30  ;;  %v1148_v25 = vperm.slane %v3984_v31, %v3646_v17  ;;  %v1149_v44 = vperm.slane %v3996_v43, %v3646_v17 }
  0xf5   :  { %v1147_v5 = vperm.slane %v3988_v23, %v3646_v17 }
  0xf7   :  { %v1183_v32 = vsel %vm1155_vm5, %v1148_v25, %v1147_v5 }
  0xf8   :  { %v1184_v56 = vsel %vm1157_vm6, %v1149_v44, %v1183_v32 }
  0xfa   :  { %v1043_v55 = vpop.xlane.xlu1 %1042  ;;  %v1046_v14 = vpop.xlane.xlu2 %1045 }
  0xfb   :  { %v1040_v11 = vpop.xlane.xlu0 %1039  ;;  %v4003_v21 = vsel %vm3976_vm3, %v1043_v55, -1e+30  ;;  %v4016_v2 = vsel %vm3976_vm3, %v1046_v14, -1e+30 }
  0xfc   :  { %v4007_v28 = vsel %vm3976_vm3, %v1040_v11, -1e+30  ;;  %v1151_v3 = vperm.slane %v4003_v21, %v3646_v17  ;;  %v1152_v37 = vperm.slane %v4016_v2, %v3646_v17 }
  0xfd   :  { %v1150_v6 = vperm.slane %v4007_v28, %v3646_v17 }
  0xff   :  { %v1185_v58 = vsel %vm1159_vm7, %v1150_v6, %v1184_v56 }
 0x100   :  { %v1186_v61 = vsel %vm1161_vm8, %v1151_v3, %v1185_v58 }
 0x101   :  { %v1187_v0 = vsel %vm1163_vm11, %v1152_v37, %v1186_v61 }
 0x102   :  { %v1052_v49 = vpop.xlane.xlu1 %1051 }
 0x103   :  { %v4023_v52 = vsel %vm3976_vm3, %v1052_v49, -1e+30  ;;  %v1049_v34 = vpop.xlane.xlu0 %1048 }
 0x104   :  { %v1154_v26 = vperm.slane %v4023_v52, %v3646_v17  ;;  %v4030_v27 = vsel %vm3976_vm3, %v1049_v34, -1e+30 }
 0x105   :  { %v1153_v9 = vperm.slane %v4030_v27, %v3646_v17 }
 0x107   :  { %v1188_v15 = vsel %vm4417_vm2, %v1153_v9, %v1187_v0 }
 0x108   :  { %v1189_v40 = vsel %vm4416_vm4, %v1154_v26, %v1188_v15 }
 0x109   :  { %v1204_v59 = vsel %vm1194_vm1, %v1189_v40, -inf }
 0x10a   :  { %1205 = vmax.xlane.f32.xlu2 %v1204_v59 }
 0x13c   :  { %v1197_v20 = vpop.xlane.xlu2 %1196 }
 0x13d   :  { %v1211_v35 = vperm.slane %v1197_v20, 0  ;;  %v1212_v62 = vperm.slane %v1197_v20, 1  ;;  %v1213_v7 = vperm.slane %v1197_v20, 2  ;;  %v1214_v55 = vperm.slane %v1197_v20, 3 }
 0x13e   :  { %v1215_v32 = vperm.slane %v1197_v20, 4  ;;  %v1216_v58 = vperm.slane %v1197_v20, 5  ;;  %v1217_v37 = vperm.slane %v1197_v20, 6  ;;  %v1218_v0 = vperm.slane %v1197_v20, 7  ;;  %v444_v20 = vld [vmem:[%s4403_s7] sm:$0x3] }
 0x13f   :  { %v1275_v25 = vsub.f32 %v3653_v51, %v1211_v35  ;;  %v1276_v5 = vsub.f32 %v3690_v10, %v1212_v62  ;;  %v1277_v44 = vsub.f32 %v3665_v24, %v1213_v7  ;;  %v1278_v6 = vsub.f32 %v3680_v47, %v1214_v55  ;;  %s2804_s7 = smov 64  }
 0x140   :  { %v1279_v3 = vsub.f32 %v3740_v30, %v1215_v32  ;;  %v1280_v61 = vsub.f32 %v3735_v12, %v1216_v58  ;;  %v1281_v26 = vsub.f32 %v3766_v18, %v1217_v37  ;;  %v1282_v18 = vsub.f32 %v3784_v63, %v1218_v0  ;;  %v558_v7 = vpop.f32.mrf.mxu1  ;;  %v4060_v63 = vpop.f32.mrf.mxu0 }
 0x141   :  { %v1307_v11 = vmul.f32 1.442695, %v1275_v25  ;;  %v1309_v14 = vmul.f32 1.442695, %v1276_v5  ;;  %v1311_v56 = vmul.f32 1.442695, %v1277_v44 }
 0x142   :  { %v1313_v49 = vmul.f32 1.442695, %v1278_v6  ;;  %v1315_v34 = vmul.f32 1.442695, %v1279_v3  ;;  %v1317_v9 = vmul.f32 1.442695, %v1280_v61 }
 0x143   :  { %2721 = vpow2.f32 %v1307_v11  ;;  %v1319_v15 = vmul.f32 1.442695, %v1281_v26  ;;  %v1321_v5 = vmul.f32 1.442695, %v1282_v18  ;;  %v4057_v44 = vperm.slane %v444_v20, 1 }
 0x144   :  { %2723 = vpow2.f32 %v1309_v14 }
 0x145   :  { %2725 = vpow2.f32 %v1311_v56  ;;  %v4064_v3 = vadd.f32 %v558_v7, %v4057_v44 }
 0x146   :  { %2727 = vpow2.f32 %v1313_v49 }
 0x147   :  { %2729 = vpow2.f32 %v1315_v34 }
 0x148   :  { %2731 = vpow2.f32 %v1317_v9  ;;  %v560_v49 = vpop.f32.mrf.mxu1 }
 0x149   :  { %v2722_v51 = vpop.eup %2721  ;;  %2733 = vpow2.f32 %v1319_v15 }
 0x14a   :  { %v2724_v10 = vpop.eup %2723  ;;  %1856 = vperm.xlu0 %2707, %v2722_v51   ;;  %v1372_v51 = vsel %vm1371_vm14, %v4064_v3, -inf }
 0x14b   :  { %v2726_v24 = vpop.eup %2725  ;;  %1859 = vperm.xlu1 %2708, %v2724_v10   ;;  %v1373_v0 = vrot.slane %v1372_v51, 4 }
 0x14c   :  { %1862 = vperm.xlu2 %2709, %v2726_v24   ;;  %v2728_v35 = vpop.eup %2727  ;;  %v4072_v24 = vadd.f32 %v560_v49, %v4057_v44 }
 0x14d   :  { %v2730_v12 = vpop.eup %2729 }
 0x14e   :  { %v2732_v11 = vpop.eup %2731 }
 0x14f   :  { %v4045_v47 = vpop.xlane.xlu0 %1199 }
 0x150   :  { %v1223_v30 = vperm.slane %v4045_v47, 4  ;;  %v1219_v40 = vperm.slane %v4045_v47, 0  ;;  %v1225_v39 = vperm.slane %v4045_v47, 6  ;;  %v1220_v32 = vperm.slane %v4045_v47, 1 }
 0x151   :  { %v1221_v56 = vperm.slane %v4045_v47, 2  ;;  %v1222_v37 = vperm.slane %v4045_v47, 3  ;;  %v1224_v26 = vperm.slane %v4045_v47, 5 }
 0x152   :  { %v1287_v59 = vsub.f32 %v3839_v16, %v1223_v30  ;;  %v1283_v25 = vsub.f32 %v3796_v29, %v1219_v40  ;;  %v1289_v16 = vsub.f32 %v3859_v54, %v1225_v39  ;;  %v2734_v29 = vpop.eup %2733  ;;  %v1284_v54 = vsub.f32 %v3800_v60, %v1220_v32 }
 0x153   :  { %1865 = vperm.xlu1 %2708, %v2728_v35   ;;  %v1285_v58 = vsub.f32 %v3827_v33, %v1221_v56  ;;  %v4075_v60 = vperm.slane %v444_v20, 0  ;;  %v541_v33 = vpop.f32.mrf.mxu0  ;;  %v1286_v15 = vsub.f32 %v3812_v57, %v1222_v37  ;;  %v1379_v40 = vsel %vm1371_vm14, %v4072_v24, -inf }
 0x154   :  { %v1331_v62 = vmul.f32 1.442695, %v1287_v59  ;;  %1868 = vperm.xlu2 %2709, %v2730_v12   ;;  %v1323_v55 = vmul.f32 1.442695, %v1283_v25  ;;  %v1335_v14 = vmul.f32 1.442695, %v1289_v16  ;;  %v1288_v39 = vsub.f32 %v3875_v13, %v1224_v26 }
 0x155   :  { %v1325_v34 = vmul.f32 1.442695, %v1284_v54  ;;  %v1327_v61 = vmul.f32 1.442695, %v1285_v58  ;;  %v4084_v35 = vadd.f32 %v541_v33, %v4075_v60  ;;  %v1329_v18 = vmul.f32 1.442695, %v1286_v15 }
 0x156   :  { %2735 = vpow2.f32 %v1331_v62  ;;  %v1374_v62 = vmax.f32 %v1372_v51, %v1373_v0  ;;  %v1380_v7 = vrot.slane %v1379_v40, 4  ;;  %v1333_v16 = vmul.f32 1.442695, %v1288_v39  ;;  %v563_v39 = vpop.f32.mrf.mxu1 }
 0x157   :  { %2737 = vpow2.f32 %v1321_v5  ;;  %v1226_v5 = vperm.slane %v4045_v47, 7  ;;  %v1757_v13 = vsel %vm1749_vm9, %v4084_v35, 0.0 }
 0x158   :  { %2739 = vpow2.f32 %v1323_v55 }
 0x159   :  { %2741 = vpow2.f32 %v1335_v14  ;;  %v1375_v14 = vrot.slane %v1374_v62, 2  ;;  %v1290_v47 = vsub.f32 %v3863_v45, %v1226_v5 }
 0x15a   :  { %2743 = vpow2.f32 %v1325_v34 }
 0x15b   :  { %1871 = vperm.xlu1 %2708, %v2732_v11   ;;  %2745 = vpow2.f32 %v1327_v61  ;;  %v1376_v54 = vmax.f32 %v1374_v62, %v1375_v14  ;;  %v1337_v61 = vmul.f32 1.442695, %v1290_v47 }
 0x15c   :  { %v2736_v6 = vpop.eup %2735  ;;  %1874 = vperm.xlu2 %2709, %v2734_v29   ;;  %2747 = vpow2.f32 %v1329_v18  ;;  %v1381_v29 = vmax.f32 %v1379_v40, %v1380_v7  ;;  %v4101_v7 = vpop.f32.mrf.mxu0 }
 0x15d   :  { %1937 = vperm.xlu0 %2707, %v2736_v6   ;;  %v2738_v10 = vpop.eup %2737  ;;  %v1758_v6 = vrot.slane %v1757_v13, 4 }
 0x15e   :  { %v2740_v9 = vpop.eup %2739  ;;  %v1382_v49 = vrot.slane %v1381_v29, 2 }
 0x15f   :  { %v2742_v30 = vpop.eup %2741 }
 0x160   :  { %v2744_v55 = vpop.eup %2743 }
 0x161   :  { %v2746_v11 = vpop.eup %2745 }
 0x162   :  { %v2748_v34 = vpop.eup %2747 }
 0x163   :  { %1877 = vperm.xlu1 %2708, %v2738_v10   ;;  %v1759_v10 = vadd.f32 %v1758_v6, %v1757_v13 }
 0x164   :  { %1925 = vperm.xlu2 %2709, %v2740_v9  }
 0x165   :  { %1943 = vperm.xlu0 %2707, %v2742_v30   ;;  %v4080_v59 = vpop.xlane.xlu1 %1202  ;;  %v1377_v30 = vrot.slane %v1376_v54, 1  ;;  %v1760_v0 = vrot.slane %v1759_v10, 2 }
 0x166   :  { %v1228_v12 = vperm.slane %v4080_v59, 1  ;;  %v1227_v57 = vperm.slane %v4080_v59, 0  ;;  %v1230_v20 = vperm.slane %v4080_v59, 3  ;;  %v1229_v51 = vperm.slane %v4080_v59, 2 }
 0x167   :  { %v1378_v15 = vmax.f32 %v1376_v54, %v1377_v30  ;;  %v1232_v62 = vperm.slane %v4080_v59, 5  ;;  %v1234_v47 = vperm.slane %v4080_v59, 7 }
 0x168   :  { %v1292_v25 = vsub.f32 %v3910_v41, %v1228_v12  ;;  %v1291_v56 = vsub.f32 %v3916_v8, %v1227_v57  ;;  %v1294_v41 = vsub.f32 %v3943_v4, %v1230_v20  ;;  %v1231_v8 = vperm.slane %v4080_v59, 4 }
 0x169   :  { %v1383_v4 = vmax.f32 %v1381_v29, %v1382_v49  ;;  %v1293_v45 = vsub.f32 %v3924_v48, %v1229_v51  ;;  %v1761_v57 = vadd.f32 %v1760_v0, %v1759_v10  ;;  %v1233_v20 = vperm.slane %v4080_v59, 6  ;;  %v565_v49 = vpop.f32.mrf.mxu1 }
 0x16a   :  { %v1341_v32 = vmul.f32 1.442695, %v1292_v25  ;;  %v1339_v58 = vmul.f32 1.442695, %v1291_v56  ;;  %v1345_v37 = vmul.f32 1.442695, %v1294_v41  ;;  %v1295_v33 = vsub.f32 %v3939_v50, %v1231_v8 }
 0x16b   :  { %1928 = vperm.xlu1 %2708, %v2744_v55   ;;  %v1384_v40 = vrot.slane %v1383_v4, 1  ;;  %v1343_v12 = vmul.f32 1.442695, %v1293_v45  ;;  %v1400_v48 = vsub.f32 %v4064_v3, %v1378_v15  ;;  %v4106_v55 = vadd.f32 %v563_v39, %v4057_v44 }
 0x16c   :  { %1931 = vperm.xlu2 %2709, %v2746_v11   ;;  %2749 = vpow2.f32 %v1341_v32  ;;  %v1347_v25 = vmul.f32 1.442695, %v1295_v33  ;;  %v1296_v13 = vsub.f32 %v3956_v19, %v1232_v62  ;;  %v1762_v32 = vrot.slane %v1761_v57, 1 }
 0x16d   :  { %2751 = vpow2.f32 %v1333_v16  ;;  %v1385_v50 = vmax.f32 %v1383_v4, %v1384_v40  ;;  %v1297_v11 = vsub.f32 %v3969_v1, %v1233_v20  ;;  %v1404_v56 = vmul.f32 1.442695, %v1400_v48 }
 0x16e   :  { %2753 = vpow2.f32 %v1339_v58  ;;  %v4114_v3 = vadd.f32 %v4060_v63, %v4075_v60  ;;  %v1386_v41 = vsel %vm1371_vm14, %v4106_v55, -inf  ;;  %v1349_v6 = vmul.f32 1.442695, %v1296_v13 }
 0x16f   :  { %2755 = vpow2.f32 %v1345_v37  ;;  %v1401_v29 = vsub.f32 %v4072_v24, %v1385_v50  ;;  %v1763_v19 = vadd.f32 %v1762_v32, %v1761_v57  ;;  %v1351_v54 = vmul.f32 1.442695, %v1297_v11  ;;  %v546_v24 = vpop.f32.mrf.mxu0 }
 0x170   :  { %2757 = vpow2.f32 %v1337_v61  ;;  %v1750_v63 = vsel %vm1749_vm9, %v4114_v3, 0.0  ;;  %v1387_v51 = vrot.slane %v1386_v41, 4  ;;  %v1298_v59 = vsub.f32 %v3960_v53, %v1234_v47 }
 0x171   :  { %2759 = vpow2.f32 %v1343_v12  ;;  %v4126_v10 = vadd.f32 %v565_v49, %v4057_v44  ;;  %v1751_v8 = vrot.slane %v1750_v63, 4 }
 0x172   :  { %v2750_v26 = vpop.eup %2749  ;;  %2761 = vpow2.f32 %v1347_v25  ;;  %v1353_v4 = vmul.f32 1.442695, %v1298_v59 }
 0x173   :  { %v2752_v9 = vpop.eup %2751  ;;  %1934 = vperm.xlu1 %2708, %v2748_v34   ;;  %1997 = vperm.xlu0 %2707, %v2750_v26   ;;  %2763 = vpow2.f32 %v1404_v56  ;;  %v1406_v34 = vmul.f32 1.442695, %v1401_v29  ;;  %v4130_v26 = vadd.f32 %v546_v24, %v4075_v60  ;;  %v1393_v53 = vsel %vm1371_vm14, %v4126_v10, -inf }
 0x174   :  { %1940 = vperm.xlu2 %2709, %v2752_v9   ;;  %v2754_v18 = vpop.eup %2753  ;;  %2765 = vpow2.f32 %v1349_v6  ;;  %v1388_v9 = vmax.f32 %v1386_v41, %v1387_v51  ;;  %v1752_v15 = vadd.f32 %v1751_v8, %v1750_v63  ;;  %v1394_v62 = vrot.slane %v1393_v53, 4 }
 0x175   :  { %v2756_v16 = vpop.eup %2755  ;;  %2767 = vpow2.f32 %v1351_v54 }
 0x176   :  { %v2758_v5 = vpop.eup %2757  ;;  %2769 = vpow2.f32 %v1406_v34  ;;  %v1389_v39 = vrot.slane %v1388_v9, 2  ;;  %v1753_v20 = vrot.slane %v1752_v15, 2  ;;  %v1395_v50 = vmax.f32 %v1393_v53, %v1394_v62 }
 0x177   :  { %v2760_v1 = vpop.eup %2759  ;;  %2771 = vpow2.f32 %v1353_v4 }
 0x178   :  { %v2762_v37 = vpop.eup %2761  ;;  %v1754_v29 = vadd.f32 %v1753_v20, %v1752_v15 }
 0x179   :  { %v2764_v0 = vpop.eup %2763 }
 0x17a   :  { %v2766_v33 = vpop.eup %2765  ;;  %v1755_v54 = vrot.slane %v1754_v29, 1 }
 0x17b   :  { %1994 = vperm.xlu1 %2708, %v2754_v18   ;;  %2003 = vperm.xlu0 %2707, %v2756_v16   ;;  %v2768_v40 = vpop.eup %2767  ;;  %v1390_v16 = vmax.f32 %v1388_v9, %v1389_v39 }
 0x17c   :  { %1946 = vperm.xlu2 %2709, %v2758_v5   ;;  %v2770_v25 = vpop.eup %2769  ;;  %v4142_v5 = vadd.f32 %v4101_v7, %v4075_v60  ;;  %v1396_v60 = vrot.slane %v1395_v50, 2  ;;  %v1756_v59 = vadd.f32 %v1755_v54, %v1754_v29 }
 0x17d   :  { %v4110_v14 = vpop.xlane.xlu2 %1205  ;;  %v2710_v11 = vpack.i.bf16 %v2770_v25, %v2764_v0  ;;  %v2772_v56 = vpop.eup %2771 }
 0x17e   :  { %v1235_v58 = vperm.slane %v4110_v14, 0  ;;  %v1236_v30 = vperm.slane %v4110_v14, 1  ;;  %v1239_v45 = vperm.slane %v4110_v14, 4  ;;  %v1764_v6 = vsel %vm1749_vm9, %v4142_v5, 0.0 }
 0x17f   :  { %v1238_v49 = vperm.slane %v4110_v14, 3 }
 0x180   :  { %v1299_v61 = vsub.f32 %v3988_v23, %v1235_v58  ;;  %v1771_v23 = vsel %vm1749_vm9, %v4130_v26, 0.0  ;;  %v1300_v12 = vsub.f32 %v3984_v31, %v1236_v30  ;;  %v1303_v18 = vsub.f32 %v4003_v21, %v1239_v45 }
 0x181   :  { %v1772_v57 = vrot.slane %v1771_v23, 4  ;;  %v1237_v31 = vperm.slane %v4110_v14, 2  ;;  %v1391_v21 = vrot.slane %v1390_v16, 1 }
 0x182   :  { %v1355_v44 = vmul.f32 1.442695, %v1299_v61  ;;  %v1357_v48 = vmul.f32 1.442695, %v1300_v12  ;;  %v1363_v13 = vmul.f32 1.442695, %v1303_v18 }
 0x183   :  { %2000 = vperm.xlu1 %2708, %v2760_v1   ;;  %1784 = vrot.lane.b32.xlu0 %v1763_v19, %s2804_s7  ;;  %v1773_v32 = vadd.f32 %v1772_v57, %v1771_v23  ;;  %v1301_v47 = vsub.f32 %v3996_v43, %v1237_v31  ;;  %v1765_v19 = vrot.slane %v1764_v6, 4  ;;  %v1392_v58 = vmax.f32 %v1390_v16, %v1391_v21 }
 0x184   :  { %2006 = vperm.xlu2 %2709, %v2762_v37   ;;  %2773 = vpow2.f32 %v1355_v44  ;;  %v1397_v1 = vmax.f32 %v1395_v50, %v1396_v60  ;;  %v1302_v43 = vsub.f32 %v4007_v28, %v1238_v49  ;;  %v1240_v44 = vperm.slane %v4110_v14, 5 }
 0x185   :  { %2775 = vpow2.f32 %v1357_v48  ;;  %v1774_v7 = vrot.slane %v1773_v32, 2  ;;  %v1359_v51 = vmul.f32 1.442695, %v1301_v47  ;;  %v1766_v34 = vadd.f32 %v1765_v19, %v1764_v6 }
 0x186   :  { %2777 = vpow2.f32 %v1363_v13  ;;  %v1402_v61 = vsub.f32 %v4106_v55, %v1392_v58  ;;  %v1398_v8 = vrot.slane %v1397_v1, 1  ;;  %v1304_v28 = vsub.f32 %v4016_v2, %v1240_v44 }
 0x187   :  { %v1775_v63 = vadd.f32 %v1774_v7, %v1773_v32  ;;  %2779 = vpow2.f32 %v1359_v51  ;;  %v1767_v30 = vrot.slane %v1766_v34, 2  ;;  %v1241_v12 = vperm.slane %v4110_v14, 6 }
 0x188   :  { %v1408_v4 = vmul.f32 1.442695, %v1402_v61  ;;  %v1399_v45 = vmax.f32 %v1397_v1, %v1398_v8  ;;  %v1365_v18 = vmul.f32 1.442695, %v1304_v28  ;;  %v1242_v57 = vperm.slane %v4110_v14, 7 }
 0x189   :  { %v1776_v9 = vrot.slane %v1775_v63, 1 }
 0x18a   :  { %v2774_v41 = vpop.eup %2773  ;;  %2781 = vpow2.f32 %v1408_v4  ;;  %v1403_v55 = vsub.f32 %v4126_v10, %v1399_v45  ;;  %v1305_v10 = vsub.f32 %v4030_v27, %v1241_v12  ;;  %v1306_v2 = vsub.f32 %v4023_v52, %v1242_v57  ;;  %v4455_v45 = vld [vmem:[#allocation5_spill] sm:$0xff]  ;;  %v4457_v57 = vld [vmem:[#allocation2_spill] sm:$0xff] }
 0x18b   :  { %2009 = vperm.xlu1 %2708, %v2766_v33   ;;  %1808 = vperm.xlu0 %2707, %v2764_v0   ;;  %v2776_v37 = vpop.eup %2775  ;;  %v1361_v0 = vmul.f32 1.442695, %v1302_v43  ;;  %v1777_v53 = vadd.f32 %v1776_v9, %v1775_v63  ;;  %v1768_v33 = vadd.f32 %v1767_v30, %v1766_v34  ;;  %v4453_v43 = vld [vmem:[#allocation6_spill] sm:$0xff]  ;;  %v4454_v9 = vld [vmem:[#allocation8_spill] sm:$0xff]  ;;  %vm657_vm12 = vcmp.eq.f32.partialorder %v4455_v45, -1.0 }
 0x18c   :  { %2012 = vperm.xlu2 %2709, %v2768_v40   ;;  %v2778_v24 = vpop.eup %2777  ;;  %v1410_v39 = vmul.f32 1.442695, %v1403_v55  ;;  %v1367_v48 = vmul.f32 1.442695, %v1305_v10  ;;  %v1369_v50 = vmul.f32 1.442695, %v1306_v2 }
 0x18d   :  { %v2780_v15 = vpop.eup %2779  ;;  %2783 = vpow2.f32 %v1361_v0  ;;  %v1769_v40 = vrot.slane %v1768_v33, 1  ;;  %vm658_vm13 = vcmp.eq.f32.partialorder %v4453_v43, -1.0  ;;  %vm659_vm15 = vcmp.eq.f32.partialorder %v4454_v9, -1.0  ;;  %v4459_v2 = vld [vmem:[#allocation7_spill] sm:$0xff]  ;;  %v4251_v43 = vld [vmem:[%s4404_s10] ss:$0 sm:$0xff] }
 0x18e   :  { %2785 = vpow2.f32 %v1410_v39  ;;  %vm652_vm14 = vcmp.eq.f32.partialorder %v4457_v57, -1.0 }
 0x18f   :  { %v1770_v16 = vadd.f32 %v1769_v40, %v1768_v33  ;;  %2787 = vpow2.f32 %v1365_v18 }
 0x190   :  { %v2782_v62 = vpop.eup %2781  ;;  %2789 = vpow2.f32 %v1367_v48 }
 0x191   :  { %2791 = vpow2.f32 %v1369_v50 }
 0x193   :  { %2015 = vperm.xlu1 %2708, %v2772_v56   ;;  %2711 = vrot.lane.b32.xlu0 %v2710_v11, %s2804_s7  ;;  %v2784_v20 = vpop.eup %2783 }
 0x194   :  { %2063 = vperm.xlu2 %2709, %v2774_v41   ;;  %v2786_v13 = vpop.eup %2785 }
 0x195   :  { %v2788_v32 = vpop.eup %2787 }
 0x196   :  { %v2790_v11 = vpop.eup %2789 }
 0x197   :  { %v2792_v31 = vpop.eup %2791 }
 0x19b   :  { %2066 = vperm.xlu1 %2708, %v2776_v37   ;;  %2075 = vperm.xlu0 %2707, %v2778_v24  }
 0x19c   :  { %1782 = vrot.lane.b32.xlu2 %v1756_v59, %s2804_s7 }
 0x1a3   :  { %1813 = vperm.xlu1 %2708, %v2770_v25   ;;  %1788 = vrot.lane.b32.xlu0 %v1777_v53, %s2804_s7 }
 0x1a4   :  { %2069 = vperm.xlu2 %2709, %v2780_v15   ;;  %v4456_v15 = vmov 0.0  }
 0x1a5   :  { %v690_v55 = vsel %vm658_vm13, 1.0, %v4456_v15  ;;  %v691_v28 = vsel %vm659_vm15, 1.0, %v4456_v15  ;;  %v689_v40 = vsel %vm657_vm12, 1.0, %v4456_v15  ;;  %vm660_vm13 = vcmp.eq.f32.partialorder %v4459_v2, -1.0 }
 0x1a6   :  { %v1863_v23 = vpop.permute.xlu2 %1862  ;;  %v775_v12 = vsel %vm696_vm0, %v690_v55, inf  ;;  %v772_v18 = vsel %vm696_vm0, %v689_v40, inf  ;;  %vm661_vm15 = vcmp.eq.f32.partialorder %v3288_v46, -1.0  ;;  %vm662_vm12 = vcmp.eq.f32.partialorder %v3361_v42, -1.0 }
 0x1a7   :  { %v1881_v21 = vperm.slane %v1863_v23, %v3646_v17 }
 0x1ab   :  { %2072 = vperm.xlu1 %2708, %v2784_v20   ;;  %1818 = vperm.xlu0 %2707, %v2782_v62   ;;  %v4458_v20 = vld [vmem:[#allocation3_spill] sm:$0xff] }
 0x1ac   :  { %1786 = vrot.lane.b32.xlu2 %v1770_v16, %s2804_s7  ;;  %vm653_vm9 = vcmp.eq.f32.partialorder %v4458_v20, -1.0 }
 0x1ad   :  { %v685_v48 = vsel %vm653_vm9, 1.0, %v4456_v15  ;;  %vm655_vm9 = vcmp.eq.f32.partialorder %v3235_v38, -1.0 }
 0x1ae   :  { %v1869_v25 = vpop.permute.xlu2 %1868 }
 0x1af   :  { %v1883_v54 = vperm.slane %v1869_v25, %v3646_v17  ;;  %v684_v25 = vsel %vm652_vm14, 1.0, %v4456_v15 }
 0x1b3   :  { %1823 = vperm.xlu1 %2708, %v2786_v13   ;;  %1834 = vrot.lane.b32.xlu0 %v2782_v62, %s2804_s7  ;;  %v778_v62 = vsel %vm696_vm0, %v691_v28, inf }
 0x1b4   :  { %2078 = vperm.xlu2 %2709, %v2788_v32   ;;  %v757_v32 = vsel %vm696_vm0, %v684_v25, inf }
 0x1b6   :  { %v1875_v14 = vpop.permute.xlu2 %1874 }
 0x1b7   :  { %v1885_v51 = vperm.slane %v1875_v14, %v3646_v17  ;;  %v760_v14 = vsel %vm696_vm0, %v685_v48, inf }
 0x1bb   :  { %1836 = vrot.lane.b32.xlu1 %v2786_v13, %s2804_s7  ;;  %2081 = vperm.xlu0 %2707, %v2790_v11   ;;  %v692_v13 = vsel %vm660_vm13, 1.0, %v4456_v15  ;;  %vm663_vm13 = vcmp.eq.f32.partialorder %v3339_v22, -1.0 }
 0x1bc   :  { %2084 = vperm.xlu2 %2709, %v2792_v31   ;;  %v1857_v27 = vpop.permute.xlu0 %1856  ;;  %v781_v11 = vsel %vm696_vm0, %v692_v13, inf }
 0x1bd   :  { %v1860_v52 = vpop.permute.xlu1 %1859  ;;  %v1879_v56 = vperm.slane %v1857_v27, %v3646_v17 }
 0x1be   :  { %v1880_v29 = vperm.slane %v1860_v52, %v3646_v17  ;;  %v1926_v41 = vpop.permute.xlu2 %1925  ;;  %v4460_v52 = vld [vmem:[#allocation4_spill] sm:$0xff] }
 0x1bf   :  { %v1948_v0 = vperm.slane %v1926_v41, %v3646_v17  ;;  %vm654_vm14 = vcmp.eq.f32.partialorder %v4460_v52, -1.0 }
 0x1c0   :  { %v1887_v6 = vsel %vm1155_vm5, %v1880_v29, %v1879_v56  ;;  %v693_v56 = vsel %vm661_vm15, 1.0, %v4456_v15  ;;  %v694_v29 = vsel %vm662_vm12, 1.0, %v4456_v15  ;;  %v686_v41 = vsel %vm654_vm14, 1.0, %v4456_v15 }
 0x1c1   :  { %v1888_v60 = vsel %vm1157_vm6, %v1881_v21, %v1887_v6  ;;  %v784_v46 = vsel %vm696_vm0, %v693_v56, inf  ;;  %v787_v42 = vsel %vm696_vm0, %v694_v29, inf  ;;  %v763_v6 = vsel %vm696_vm0, %v686_v41, inf }
 0x1c2   :  { %v1743_v56 = vmul.f32 8.0, %v4142_v5 }
 0x1c5   :  { %v1866_v7 = vpop.permute.xlu1 %1865 }
 0x1c6   :  { %v1882_v47 = vperm.slane %v1866_v7, %v3646_v17  ;;  %v1932_v19 = vpop.permute.xlu2 %1931 }
 0x1c7   :  { %v1950_v33 = vperm.slane %v1932_v19, %v3646_v17  ;;  %v695_v19 = vsel %vm663_vm13, 1.0, %v4456_v15 }
 0x1c8   :  { %v1889_v58 = vsel %vm1159_vm7, %v1882_v47, %v1888_v60  ;;  %v687_v47 = vsel %vm655_vm9, 1.0, %v4456_v15 }
 0x1c9   :  { %v1890_v1 = vsel %vm1161_vm8, %v1883_v54, %v1889_v58  ;;  %v1741_v54 = vmul.f32 8.0, %v4114_v3  ;;  %v766_v58 = vsel %vm696_vm0, %v687_v47, inf }
 0x1cd   :  { %v1872_v49 = vpop.permute.xlu1 %1871 }
 0x1ce   :  { %v1884_v37 = vperm.slane %v1872_v49, %v3646_v17  ;;  %v4174_v63 = vpop.permute.xlu2 %1940  ;;  %v1729_v49 = vpop.f32.mrf.mxu2 }
 0x1cf   :  { %v4181_v59 = vpop.permute.xlu0 %1937 }
 0x1d0   :  { %v1891_v24 = vsel %vm1163_vm11, %v1884_v37, %v1890_v1  ;;  %v790_v1 = vsel %vm696_vm0, %v695_v19, inf  ;;  %vm4415_vm0 = vcmask 523264   ;;  %v1952_v57 = vperm.slane %v4181_v59, %v3646_v17 }
 0x1d1   :  { %v4179_v34 = vsel %vm4417_vm2, %v1885_v51, %v1891_v24  ;;  %v1745_v24 = vadd.f32 %v1741_v54, %v1729_v49  ;;  %v1744_v54 = vmul.f32 8.0, %v4130_v26 }
 0x1d5   :  { %v4183_v61 = vpop.permute.xlu1 %1877 }
 0x1d6   :  { %v4185_v8 = vpop.permute.xlu2 %1946  ;;  %v1886_v9 = vperm.slane %v4183_v61, %v3646_v17  ;;  %v1732_v61 = vpop.f32.mrf.mxu2 }
 0x1d7   :  { %v4189_v30 = vpop.permute.xlu0 %1943  ;;  %v1955_v52 = vperm.slane %v4185_v8, %v3646_v17 }
 0x1d8   :  { %v1893_v28 = vsel %vm4416_vm4, %v1886_v9, %v4179_v34  ;;  %v1954_v25 = vperm.slane %v4189_v30, %v3646_v17 }
 0x1dd   :  { %v1929_v4 = vpop.permute.xlu1 %1928 }
 0x1de   :  { %v1949_v53 = vperm.slane %v1929_v4, %v3646_v17  ;;  %v4194_v44 = vpop.permute.xlu2 %2006 }
 0x1e0   :  { %v1956_v23 = vsel %vm1155_vm5, %v1949_v53, %v1948_v0 }
 0x1e1   :  { %v4202_v39 = vsel %vm1157_vm6, %v1950_v33, %v1956_v23  ;;  %v1742_v23 = vmul.f32 8.0, %v4084_v35  ;;  %v1953_v35 = vperm.slane %v4174_v63, %v3646_v17 }
 0x1e5   :  { %776 = vmin.xlane.f32.xlu2 %v775_v12  ;;  %v4209_v16 = vpop.permute.xlu1 %1934  ;;  %779 = vmin.xlane.f32.xlu1 %v778_v62  ;;  %v4211_v10 = vpop.permute.xlu0 %1997 }
 0x1e6   :  { %773 = vmin.xlane.f32.xlu0 %v772_v18  ;;  %v4216_v50 = vpop.permute.xlu2 %2012  ;;  %v1951_v55 = vperm.slane %v4209_v16, %v3646_v17  ;;  %v1746_v18 = vadd.f32 %v1742_v23, %v1732_v61 }
 0x1e8   :  { %v1958_v40 = vsel %vm1159_vm7, %v1951_v55, %v4202_v39 }
 0x1e9   :  { %v1959_v16 = vsel %vm1161_vm8, %v1952_v57, %v1958_v40 }
 0x1ea   :  { %v1960_v34 = vsel %vm1163_vm11, %v1953_v35, %v1959_v16 }
 0x1eb   :  { %v1961_v59 = vsel %vm4417_vm2, %v1954_v25, %v1960_v34 }
 0x1ed   :  { %758 = vmin.xlane.f32.xlu2 %v757_v32  ;;  %v4224_v31 = vpop.permute.xlu1 %1994  ;;  %761 = vmin.xlane.f32.xlu1 %v760_v14  ;;  %v4226_v27 = vpop.permute.xlu0 %2003 }
 0x1ee   :  { %782 = vmin.xlane.f32.xlu0 %v781_v11  ;;  %v4232_v21 = vpop.permute.xlu2 %2063  ;;  %v1735_v11 = vpop.f32.mrf.mxu2  ;;  %v2017_v63 = vperm.slane %v4224_v31, %v3646_v17  ;;  %v2020_v5 = vperm.slane %v4226_v27, %v3646_v17 }
 0x1f5   :  { %785 = vmin.xlane.f32.xlu2 %v784_v46  ;;  %v4238_v60 = vpop.permute.xlu1 %2000  ;;  %788 = vmin.xlane.f32.xlu1 %v787_v42  ;;  %v1785_v7 = vpop.permute.xlu0 %1784  ;;  %v2018_v46 = vperm.slane %v4211_v10, %v3646_v17  ;;  %v1962_v42 = vsel %vm4416_vm4, %v1955_v52, %v1961_v59 }
 0x1f6   :  { %764 = vmin.xlane.f32.xlu0 %v763_v6  ;;  %v1783_v38 = vpop.permute.xlu2 %1782  ;;  %v1795_v2 = vadd.f32 %v1785_v7, %v1746_v18  ;;  %v2019_v30 = vperm.slane %v4238_v60, %v3646_v17  ;;  %v1747_v6 = vadd.f32 %v1743_v56, %v1735_v11 }
 0x1f7   :  { %v1794_v22 = vadd.f32 %v1783_v38, %v1745_v24  ;;  %v2025_v8 = vsel %vm1155_vm5, %v2018_v46, %v2017_v63  ;;  %v2086_v24 = vperm.slane %v4232_v21, %v3646_v17 }
 0x1f8   :  { %v1803_v39 = vadd.f32 %v4251_v43, %v1795_v2  ;;  %v2026_v31 = vsel %vm1157_vm6, %v2019_v30, %v2025_v8 }
 0x1f9   :  { %v1802_v3 = vadd.f32 %v4251_v43, %v1794_v22  ;;  %v2027_v19 = vsel %vm1159_vm7, %v2020_v5, %v2026_v31 }
 0x1fd   :  { %767 = vmin.xlane.f32.xlu2 %v766_v58  ;;  %v4246_v37 = vpop.permute.xlu1 %2009  ;;  %v1809_v51 = vpop.permute.xlu0 %1808  ;;  %v2021_v58 = vperm.slane %v4194_v44, %v3646_v17  ;;  %v2023_v44 = vperm.slane %v4216_v50, %v3646_v17 }
 0x1fe   :  { %791 = vmin.xlane.f32.xlu0 %v790_v1  ;;  %v1826_v0 = vmul.f32 %v1809_v51, %v1802_v3  ;;  %v2070_v20 = vpop.permute.xlu2 %2069  ;;  %v2022_v10 = vperm.slane %v4246_v37, %v3646_v17  ;;  %v1738_v1 = vpop.f32.mrf.mxu2 }
 0x1ff   :  { %v2028_v38 = vsel %vm1161_vm8, %v2021_v58, %v2027_v19  ;;  %v1748_v26 = vadd.f32 %v1744_v54, %v1738_v1  ;;  %v2551_v19 = vsel %vm3976_vm3, 1.0, %v4456_v15 }
 0x200   :  { %v2029_v22 = vsel %vm1163_vm11, %v2022_v10, %v2028_v38 }
 0x201   :  { %v2030_v21 = vsel %vm4417_vm2, %v2023_v44, %v2029_v22 }
 0x205   :  { %v4256_v4 = vpop.permute.xlu1 %2015  ;;  %v2712_v45 = vpop.permute.xlu0 %2711 }
 0x206   :  { %v2713_v53 = vunpack.i.l.bf16 %v2712_v45  ;;  %v2714_v32 = vunpack.i.h.bf16 %v2712_v45  ;;  %v1787_v29 = vpop.permute.xlu2 %1786  ;;  %v2024_v37 = vperm.slane %v4256_v4, %v3646_v17 }
 0x207   :  { %v1796_v47 = vadd.f32 %v1787_v29, %v1747_v6 }
 0x208   :  { %v1843_v33 = vsel %vm4415_vm0, %v1826_v0, %v2713_v53  ;;  %v2031_v4 = vsel %vm4416_vm4, %v2024_v37, %v2030_v21 }
 0x209   :  { %1911 = vmatpush.msrb.mxu3 %v1843_v33  ;;  %v1804_v27 = vadd.f32 %v4251_v43, %v1796_v47  ;;  %v2088_v33 = vperm.slane %v2070_v20, %v3646_v17 }
 0x20a   :  { %2564 = vmatmul.msk.f32.vlgmr.msrb.gmra.mxu3 %vm1194_vm1, %v1893_v28 }
 0x20d   :  { %v2067_v12 = vpop.permute.xlu1 %2066  ;;  %v4267_v62 = vpop.permute.xlu0 %2075 }
 0x20e   :  { %v2087_v49 = vperm.slane %v2067_v12, %v3646_v17  ;;  %v2079_v51 = vpop.permute.xlu2 %2078  ;;  %v2090_v61 = vperm.slane %v4267_v62, %v3646_v17 }
 0x20f   :  { %v2091_v20 = vperm.slane %v2079_v51, %v3646_v17 }
 0x210   :  { %v2094_v9 = vsel %vm1155_vm5, %v2087_v49, %v2086_v24  ;;  %v2179_v49 = vperm.slane %v2551_v19, 0 }
 0x211   :  { %v2095_v23 = vsel %vm1157_vm6, %v2088_v33, %v2094_v9 }
 0x215   :  { %v1814_v48 = vpop.permute.xlu1 %1813  ;;  %v1789_v13 = vpop.permute.xlu0 %1788 }
 0x216   :  { %v1827_v14 = vmul.f32 %v1814_v48, %v1803_v39  ;;  %v1797_v55 = vadd.f32 %v1789_v13, %v1748_v26  ;;  %v2085_v12 = vpop.permute.xlu2 %2084  ;;  %v2805_v48 = vmov 64  }
 0x217   :  { %v2093_v25 = vperm.slane %v2085_v12, %v3646_v17  ;;  %2717 = vset.pattern.permute.xlu0 %v2805_v48  ;;  %2715 = vset.pattern.permute.xlu1 %v2805_v48 }
 0x218   :  { %v1844_v41 = vsel %vm4415_vm0, %v1827_v14, %v2714_v32  ;;  %v1805_v40 = vadd.f32 %v4251_v43, %v1797_v55  ;;  %2716 = vset.pattern.permute.xlu2 %v2805_v48 }
 0x219   :  { %1980 = vmatpush.msra.mxu3 %v1844_v41 }
 0x21a   :  { %2565 = vmatmul.msk.f32.vlgmr.msra.gmra.mxu3 %vm1194_vm1, %v1962_v42 }
 0x21d   :  { %v2073_v60 = vpop.permute.xlu1 %2072  ;;  %v1819_v7 = vpop.permute.xlu0 %1818 }
 0x21e   :  { %v1828_v3 = vmul.f32 %v1819_v7, %v1804_v27  ;;  %v2089_v45 = vperm.slane %v2073_v60, %v3646_v17 }
 0x220   :  { %v2096_v50 = vsel %vm1159_vm7, %v2089_v45, %v2095_v23 }
 0x221   :  { %v2097_v18 = vsel %vm1161_vm8, %v2090_v61, %v2096_v50 }
 0x222   :  { %v2098_v39 = vsel %vm1163_vm11, %v2091_v20, %v2097_v18 }
 0x225   :  { %v1824_v0 = vpop.permute.xlu1 %1823  ;;  %v1835_v53 = vpop.permute.xlu0 %1834 }
 0x226   :  { %v1845_v28 = vsel %vm4415_vm0, %v1828_v3, %v1835_v53  ;;  %v1829_v57 = vmul.f32 %v1824_v0, %v1805_v40 }
 0x227   :  { %2049 = vmatpush.msrb.mxu3 %v1845_v28 }
 0x228   :  { %2566 = vmatmul.msk.f32.vlgmr.msrb.gmra.mxu3 %vm1194_vm1, %v2031_v4 }
 0x22d   :  { %v1837_v16 = vpop.permute.xlu1 %1836  ;;  %v2082_v2 = vpop.permute.xlu0 %2081 }
 0x22e   :  { %v1846_v35 = vsel %vm4415_vm0, %v1829_v57, %v1837_v16  ;;  %v2092_v34 = vperm.slane %v2082_v2, %v3646_v17 }
 0x22f   :  { %2118 = vmatpush.msra.mxu3 %v1846_v35 }
 0x230   :  { %v2099_v62 = vsel %vm4417_vm2, %v2092_v34, %v2098_v39 }
 0x231   :  { %v2100_v43 = vsel %vm4416_vm4, %v2093_v25, %v2099_v62  ;;  %v4464_v25 = vld [vmem:[#allocation9_spill] sm:$0xff] }
 0x232   :  { %2567 = vmatmul.msk.f32.vlgmr.msra.gmra.mxu3 %vm1194_vm1, %v2100_v43  ;;  %v4465_v43 = vld [vmem:[#allocation11_spill] sm:$0xff] }
 0x258   :  { %v777_v42 = vpop.xlane.xlu2 %776  ;;  %v780_v8 = vpop.xlane.xlu1 %779 }
 0x259   :  { %v774_v46 = vpop.xlane.xlu0 %773  ;;  %vm819_vm15 = vcmp.gt.f32.partialorder %v777_v42, 0.0  ;;  %vm820_vm9 = vcmp.gt.f32.partialorder %v780_v8, 0.0 }
 0x25a   :  { %vm818_vm1 = vcmp.gt.f32.partialorder %v774_v46, 0.0  ;;  %vm851_vm14 = vmxor %vm819_vm15, %vm2802_vm10 }
 0x25b   :  { %vm850_vm12 = vmxor %vm818_vm1, %vm2802_vm10  ;;  %v2553_v54 = vsel %vm851_vm14, 1.0, %v4456_v15 }
 0x25c   :  { %v2552_v47 = vsel %vm850_vm12, 1.0, %v4456_v15  ;;  %vm852_vm4 = vmxor %vm820_vm9, %vm2802_vm10  ;;  %v2181_v38 = vperm.slane %v2553_v54, 0  ;;  %v4470_v54 = vld [vmem:[#allocation10_spill] sm:$0xff] }
 0x25d   :  { %v2180_v58 = vperm.slane %v2552_v47, 0  ;;  %v2554_v51 = vsel %vm852_vm4, 1.0, %v4456_v15 }
 0x25e   :  { %v2182_v22 = vperm.slane %v2554_v51, 0 }
 0x25f   :  { %v2240_v36 = vsel %vm1155_vm5, %v2180_v58, %v2179_v49 }
 0x260   :  { %v759_v31 = vpop.xlane.xlu2 %758  ;;  %v762_v5 = vpop.xlane.xlu1 %761  ;;  %v2241_v26 = vsel %vm1157_vm6, %v2181_v38, %v2240_v36  ;;  %vm4461_vm6 = vcmask 1046534  }
 0x261   :  { %v783_v6 = vpop.xlane.xlu0 %782  ;;  %v2242_v0 = vsel %vm1159_vm7, %v2182_v22, %v2241_v26  ;;  %vm813_vm4 = vcmp.gt.f32.partialorder %v759_v31, 0.0 }
 0x262   :  { %vm821_vm13 = vcmp.gt.f32.partialorder %v783_v6, 0.0 }
 0x263   :  { %vm853_vm1 = vmxor %vm821_vm13, %vm2802_vm10  ;;  %vm4462_vm13 = vcmask 1047559  }
 0x264   :  { %v2555_v27 = vsel %vm853_vm1, 1.0, %v4456_v15 }
 0x265   :  { %v2183_v44 = vperm.slane %v2555_v27, 0 }
 0x267   :  { %v2243_v53 = vsel %vm1161_vm8, %v2183_v44, %v2242_v0 }
 0x268   :  { %v786_v7 = vpop.xlane.xlu2 %785  ;;  %v789_v10 = vpop.xlane.xlu1 %788 }
 0x269   :  { %v765_v60 = vpop.xlane.xlu0 %764  ;;  %vm822_vm0 = vcmp.gt.f32.partialorder %v786_v7, 0.0  ;;  %vm823_vm2 = vcmp.gt.f32.partialorder %v789_v10, 0.0 }
 0x26a   :  { %vm854_vm15 = vmxor %vm822_vm0, %vm2802_vm10  ;;  %vm814_vm0 = vcmp.gt.f32.partialorder %v762_v5, 0.0  ;;  %vm815_vm9 = vcmp.gt.f32.partialorder %v765_v60, 0.0 }
 0x26b   :  { %v2556_v24 = vsel %vm854_vm15, 1.0, %v4456_v15  ;;  %vm855_vm3 = vmxor %vm823_vm2, %vm2802_vm10 }
 0x26c   :  { %v2184_v3 = vperm.slane %v2556_v24, 0  ;;  %v2557_v9 = vsel %vm855_vm3, 1.0, %v4456_v15  ;;  %vm846_vm2 = vmxor %vm813_vm4, %vm2802_vm10 }
 0x26d   :  { %v2185_v33 = vperm.slane %v2557_v9, 0  ;;  %v2547_v12 = vsel %vm846_vm2, 1.0, %v4456_v15  ;;  %vm847_vm7 = vmxor %vm814_vm0, %vm2802_vm10 }
 0x26e   :  { %v2244_v21 = vsel %vm1163_vm11, %v2184_v3, %v2243_v53  ;;  %vm848_vm15 = vmxor %vm815_vm9, %vm2802_vm10  ;;  %v2175_v20 = vperm.slane %v2547_v12, 0  ;;  %v2548_v16 = vsel %vm847_vm7, 1.0, %v4456_v15 }
 0x26f   :  { %v2245_v4 = vsel %vm4461_vm6, %v2185_v33, %v2244_v21  ;;  %v2549_v2 = vsel %vm848_vm15, 1.0, %v4456_v15  ;;  %v2176_v62 = vperm.slane %v2548_v16, 0  ;;  %vm4468_vm4 = vmmov %vm4462_vm13 }
 0x270   :  { %v768_v37 = vpop.xlane.xlu2 %767  ;;  %v2236_v48 = vsel %vm1161_vm8, %v2175_v20, %v4465_v43 }
 0x271   :  { %v792_v1 = vpop.xlane.xlu0 %791  ;;  %vm816_vm1 = vcmp.gt.f32.partialorder %v768_v37, 0.0 }
 0x272   :  { %vm824_vm12 = vcmp.gt.f32.partialorder %v792_v1, 0.0  ;;  %vm849_vm3 = vmxor %vm816_vm1, %vm2802_vm10 }
 0x273   :  { %vm856_vm14 = vmxor %vm824_vm12, %vm2802_vm10  ;;  %vm4463_vm12 = vcmask 523264   ;;  %v2550_v34 = vsel %vm849_vm3, 1.0, %v4456_v15 }
 0x274   :  { %v2558_v45 = vsel %vm856_vm14, 1.0, %v4456_v15  ;;  %vm4466_vm14 = vmmov %vm4463_vm12 }
 0x275   :  { %v2186_v55 = vperm.slane %v2558_v45, 0  ;;  %vm4467_vm10 = vmmov %vm4461_vm6 }
 0x276   :  { %vm4469_vm2 = vmmov %vm4463_vm12 }
 0x277   :  { %v2246_v61 = vsel %vm4462_vm13, %v2186_v55, %v2245_v4  ;;  %vm4471_vm8 = vmmov %vm4469_vm2 }
 0x28d   :  { %v4332_v13 = vpop.f32.mrf.mxu3 }
 0x28e   :  { %v2123_v32 = vmax.f32 %v4332_v13, 1e-30 }
 0x290   :  { %2793 = vrcp.f32 %v2123_v32  ;;  %v2177_v32 = vperm.slane %v2549_v2, 0 }
 0x296   :  { %v2794_v14 = vpop.eup %2793 }
 0x297   :  { %2133 = vperm.xlu0 %2717, %v2794_v14  }
 0x29d   :  { %v4335_v17 = vpop.f32.mrf.mxu3 }
 0x29e   :  { %v2124_v52 = vmax.f32 %v4335_v17, 1e-30 }
 0x2ab   :  { %v4337_v59 = vpop.f32.mrf.mxu3 }
 0x2ac   :  { %v2125_v11 = vmax.f32 %v4337_v59, 1e-30 }
 0x2ae   :  { %2795 = vrcp.f32 %v2125_v11 }
 0x2af   :  { %2797 = vrcp.f32 %v2124_v52  ;;  %v2237_v52 = vsel %vm1163_vm11, %v2176_v62, %v2236_v48  ;;  %vm4472_vm11 = vmmov %vm4469_vm2 }
 0x2b4   :  { %v2796_v63 = vpop.eup %2795 }
 0x2b5   :  { %2143 = vperm.xlu1 %2715, %v2796_v63   ;;  %v2120_v56 = vpop.f32.mrf.mxu3  ;;  %v2798_v29 = vpop.eup %2797 }
 0x2b6   :  { %v2126_v30 = vmax.f32 %v2120_v56, 1e-30 }
 0x2b8   :  { %2799 = vrcp.f32 %v2126_v30 }
 0x2bd   :  { %2138 = vperm.xlu1 %2715, %v2798_v29  }
 0x2be   :  { %v2800_v41 = vpop.eup %2799 }
 0x2bf   :  { %2148 = vperm.xlu2 %2716, %v2800_v41  }
 0x309   :  { %v2134_v50 = vpop.permute.xlu0 %2133 }
 0x30a   :  { %v2151_v18 = vmul.f32 %v2134_v50, %v4332_v13  ;;  %v2178_v13 = vperm.slane %v2550_v34, 0 }
 0x30c   :  { %v2251_v39 = vmul.f32 %v4464_v25, %v2151_v18 }
 0x30e   :  { %v2255_v11 = vsel %vm4466_vm14, %v2251_v39, 0.0 }
 0x30f   :  { %v2256_v29 = vrot.slane %v2255_v11, 4 }
 0x311   :  { %v2257_v8 = vadd.f32 %v2256_v29, %v2255_v11 }
 0x313   :  { %v2258_v47 = vrot.slane %v2257_v8, 2 }
 0x315   :  { %v2259_v49 = vadd.f32 %v2258_v47, %v2257_v8 }
 0x317   :  { %v2260_v22 = vrot.slane %v2259_v49, 1 }
 0x319   :  { %v2149_v28 = vpop.permute.xlu2 %2148  ;;  %v2261_v45 = vadd.f32 %v2260_v22, %v2259_v49 }
 0x31a   :  { %v2154_v23 = vmul.f32 %v2149_v28, %v2120_v56  ;;  %v2238_v56 = vsel %vm4467_vm10, %v2177_v32, %v2237_v52 }
 0x31b   :  { %v2239_v41 = vsel %vm4468_vm4, %v2178_v13, %v2238_v56  ;;  %v2283_v53 = vmul.f32 0.125, %v2261_v45 }
 0x31c   :  { %v2254_v40 = vmul.f32 %v2246_v61, %v2154_v23 }
 0x31e   :  { %v2276_v57 = vsel %vm4463_vm12, %v2254_v40, 0.0 }
 0x31f   :  { %v2277_v35 = vrot.slane %v2276_v57, 4 }
 0x321   :  { %v2278_v14 = vadd.f32 %v2277_v35, %v2276_v57 }
 0x323   :  { %v2279_v15 = vrot.slane %v2278_v14, 2 }
 0x325   :  { %v2280_v6 = vadd.f32 %v2279_v15, %v2278_v14 }
 0x327   :  { %v2144_v63 = vpop.permute.xlu1 %2143  ;;  %v2281_v10 = vrot.slane %v2280_v6, 1 }
 0x328   :  { %v2153_v30 = vmul.f32 %v2144_v63, %v4337_v59 }
 0x329   :  { %v2282_v36 = vadd.f32 %v2281_v10, %v2280_v6 }
 0x32a   :  { %v2253_v46 = vmul.f32 %v2239_v41, %v2153_v30 }
 0x32b   :  { %v2286_v44 = vmul.f32 0.125, %v2282_v36 }
 0x32c   :  { %v2269_v42 = vsel %vm4469_vm2, %v2253_v46, 0.0 }
 0x32d   :  { %v2270_v31 = vrot.slane %v2269_v42, 4 }
 0x32f   :  { %v2271_v5 = vadd.f32 %v2270_v31, %v2269_v42  ;;  %v2139_v60 = vpop.permute.xlu1 %2138 }
 0x330   :  { %v2152_v7 = vmul.f32 %v2139_v60, %v4335_v17 }
 0x331   :  { %v2272_v19 = vrot.slane %v2271_v5, 2 }
 0x332   :  { %v2252_v58 = vmul.f32 %v4470_v54, %v2152_v7 }
 0x333   :  { %v2273_v59 = vadd.f32 %v2272_v19, %v2271_v5 }
 0x334   :  { %v2262_v1 = vsel %vm4471_vm8, %v2252_v58, 0.0 }
 0x335   :  { %v2263_v38 = vrot.slane %v2262_v1, 4  ;;  %v2274_v51 = vrot.slane %v2273_v59, 1 }
 0x337   :  { %v2264_v27 = vadd.f32 %v2263_v38, %v2262_v1  ;;  %v2275_v24 = vadd.f32 %v2274_v51, %v2273_v59 }
 0x339   :  { %v2265_v37 = vrot.slane %v2264_v27, 2  ;;  %v2285_v26 = vmul.f32 0.125, %v2275_v24 }
 0x33b   :  { %v2266_v3 = vadd.f32 %v2265_v37, %v2264_v27  ;;  %v2293_v17 = vsel %vm1155_vm5, %v2286_v44, %v2285_v26 }
 0x33c   :  { %2294 = vrot.lane.b32.xlu2 %v2293_v17, %s2804_s7 }
 0x33d   :  { %v2267_v9 = vrot.slane %v2266_v3, 1 }
 0x33f   :  { %v2268_v0 = vadd.f32 %v2267_v9, %v2266_v3 }
 0x341   :  { %v2284_v33 = vmul.f32 0.125, %v2268_v0 }
 0x343   :  { %v2289_v21 = vsel %vm1155_vm5, %v2284_v33, %v2283_v53 }
 0x396   :  { %v2295_v55 = vpop.permute.xlu2 %2294 }
 0x397   :  { %v2297_v28 = vsel %vm4472_vm11, %v2289_v21, %v2295_v55 }
 0x398   :  { %2298 = vst [vmem:[%s4405_s11] sm:$0x3] %v2297_v28 }

</bundles_post_ra>
